<compile_context>
chip_gen: v5e
topology: v5e:2x2
jax: 0.10.0
libtpu: 0.0.40
codegen_flags: <defaults>
</compile_context>

<pallas_src>
import jax
import jax.numpy as jnp
from jax.experimental import pallas as pl
from jax.experimental.pallas import tpu as pltpu

LANE = 128  # elements packed per row (vreg lane width)


# ----------------------------------------------------------------------------
# kernel
# ----------------------------------------------------------------------------
def distance_expansion_kernel(x_ref, rep_ref, c_ref, out_ref):
    # x_ref:   (TM, 128)      lane-dense packed input elements
    # rep_ref: (128, 128*S)   0/1 replication matrix, rep[q, q*S + s] = 1
    # c_ref:   (1, 128*S)     c[q*S + s] = 1 + starter[s]   (constant-folded)
    # out_ref: (TM, 128*S)
    x_rep = jnp.dot(
        x_ref[...], rep_ref[...],
        precision=jax.lax.Precision.HIGHEST,        # exact f32 replication
        preferred_element_type=jnp.float32,
    )                                                # (TM, 128*S) on the MXU
    d = c_ref[...] - x_rep                           # (1 + starter) - x
    out_ref[...] = d * d                             # one lane-dense store


# ----------------------------------------------------------------------------
# wrapper
# ----------------------------------------------------------------------------
def distance_expansion(x, size=5, row_tile=1024):
    """Pallas equivalent of DistanceExpansion.forward for x of shape (B, N, F)."""
    B, N, F = x.shape
    S = int(size)
    E = B * N * F                                    # total scalar elements

    # host-side constants
    starter = jnp.arange(S, dtype=jnp.float32) / float(S)          # (S,)
    c = 1.0 + starter                                               # fold the "1 -"
    c_rep = jnp.tile(c, (LANE,)).reshape(1, LANE * S)               # (1, 128*S)
    rep = jnp.repeat(jnp.eye(LANE, dtype=jnp.float32), S, axis=1)   # (128, 128*S)

    # lane-dense repack: element-order flatten, pack 128 elements per row.
    flat = x.reshape(-1).astype(jnp.float32)
    E_pad = pl.cdiv(E, LANE) * LANE
    padded = E_pad != E
    if padded:  # at most 127 extra elements; only hit when E % 128 != 0
        flat = jnp.pad(flat, (0, E_pad - E))
    packed_rows = E_pad // LANE
    x2 = flat.reshape(packed_rows, LANE)

    # row tile: big enough to amortize per-step overhead, sublane-legal.
    tm = min(int(row_tile), packed_rows)
    if tm != packed_rows:                            # not the full extent
        tm = max(8, (tm // 8) * 8)                   # multiple of 8 for (8,128) rule
    grid = (pl.cdiv(packed_rows, tm),)               # ragged last block is masked

    cost = pl.CostEstimate(
        flops=3 * E * S,
        transcendentals=0,
        bytes_accessed=4 * E * (1 + S),
    )

    out = pl.pallas_call(
        distance_expansion_kernel,
        out_shape=jax.ShapeDtypeStruct((packed_rows, LANE * S), jnp.float32),
        grid=grid,
        in_specs=[
            pl.BlockSpec((tm, LANE), lambda i: (i, 0)),        # row tile of x
            pl.BlockSpec((LANE, LANE * S), lambda i: (0, 0)),  # constant, reused
            pl.BlockSpec((1, LANE * S), lambda i: (0, 0)),     # constant, reused
        ],
        out_specs=pl.BlockSpec((tm, LANE * S), lambda i: (i, 0)),
        compiler_params=pltpu.CompilerParams(
            dimension_semantics=("parallel",)),
        cost_estimate=cost,
    )(x2, rep, c_rep)

    out_flat = out.reshape(-1)
    if padded:
        out_flat = out_flat[: E * S]
    return out_flat.reshape(B, N, F * S)


# ----------------------------------------------------------------------------
# pure-JAX reference (exactly the PyTorch forward)
# ----------------------------------------------------------------------------
def _reference(x, size=5):
    B, N, F = x.shape
    starter = jnp.arange(size, dtype=jnp.float32) / float(size)
    flat = x.reshape(-1, 1).astype(jnp.float32)
    out = (1.0 - (flat - starter[None, :])) ** 2
    return out.reshape(B, N, F * size)


# ----------------------------------------------------------------------------
if __name__ == "__main__":
    B, N, F = 2, 64, 4         # batch, points, features per point (E = 512)
    size = 5                   # DistanceExpansion default expansion size

    key = jax.random.PRNGKey(0)
    x = jax.random.uniform(key, (B, N, F), jnp.float32)

    y = distance_expansion(x, size=size)
    jax.block_until_ready(y)

    y_ref = _reference(x, size=size)
    assert y.shape == (B, N, F * size)
    assert bool(jnp.all(jnp.isfinite(y)))
    assert bool(jnp.allclose(y, y_ref, atol=1e-6, rtol=1e-6))

    # also exercise the ragged / lane-padded path once (E % 128 != 0)
    x_odd = jax.random.uniform(jax.random.PRNGKey(1), (2, 9, 3), jnp.float32)
    y_odd = distance_expansion(x_odd, size=size)
    jax.block_until_ready(y_odd)
    assert bool(jnp.allclose(y_odd, _reference(x_odd, size=size),
                             atol=1e-6, rtol=1e-6))

    print("KERNEL_OK")
</pallas_src>

<mosaic_0001>
module attributes {stable_mosaic.version = 11 : i64} {
  func.func @distance_expansion_kernel(%arg0: i32, %arg1: memref<4x128xf32, #tpu.memory_space<vmem>>, %arg2: memref<128x640xf32, #tpu.memory_space<vmem>>, %arg3: memref<1x640xf32, #tpu.memory_space<vmem>>, %arg4: memref<4x640xf32, #tpu.memory_space<vmem>>) attributes {dimension_semantics = [#tpu.dimension_semantics<parallel>], iteration_bounds = array<i64: 1>, scalar_prefetch = 0 : i64, scratch_operands = 0 : i64, tpu.core_type = #tpu.core_type<tc>, window_params = [{transform_indices = @transform_0, window_bounds = array<i64: 4, 128>}, {pipeline_mode = #tpu.pipeline_mode<synchronous>, transform_indices = @transform_1, window_bounds = array<i64: 128, 640>}, {pipeline_mode = #tpu.pipeline_mode<synchronous>, transform_indices = @transform_2, window_bounds = array<i64: 1, 640>}, {transform_indices = @transform_3, window_bounds = array<i64: 4, 640>}]} {
    %c0 = arith.constant 0 : index
    %c0_0 = arith.constant 0 : index
    %0 = vector.load %arg1[%c0, %c0_0] : memref<4x128xf32, #tpu.memory_space<vmem>>, vector<4x128xf32>
    %c0_1 = arith.constant 0 : index
    %c0_2 = arith.constant 0 : index
    %1 = vector.load %arg2[%c0_1, %c0_2] : memref<128x640xf32, #tpu.memory_space<vmem>>, vector<128x640xf32>
    %cst = arith.constant dense<0.000000e+00> : vector<4x640xf32>
    %2 = tpu.matmul %0, %1, %cst {dimension_numbers = #tpu.dot_dimension_numbers<[1], [0], [0], [1], [0, 0, 1, 1], [], []>, precision = #tpu.contract_precision<fp32>} : vector<4x128xf32>, vector<128x640xf32>, vector<4x640xf32> -> vector<4x640xf32>
    %c0_3 = arith.constant 0 : index
    %c0_4 = arith.constant 0 : index
    %3 = vector.load %arg3[%c0_3, %c0_4] : memref<1x640xf32, #tpu.memory_space<vmem>>, vector<1x640xf32>
    %4 = vector.broadcast %3 : vector<1x640xf32> to vector<4x640xf32>
    %5 = arith.subf %4, %2 : vector<4x640xf32>
    %6 = arith.mulf %5, %5 : vector<4x640xf32>
    %c0_5 = arith.constant 0 : index
    %c0_6 = arith.constant 0 : index
    %7 = vector.load %arg4[%c0_5, %c0_6] : memref<4x640xf32, #tpu.memory_space<vmem>>, vector<4x640xf32>
    tpu.vector_store %arg4[%c0_5, %c0_6], %6 {strides = array<i32>} : memref<4x640xf32, #tpu.memory_space<vmem>>, vector<4x640xf32>,
    return
  }
  func.func @transform_0(%arg0: i32) -> (i32, i32) {
    %c0_i32 = arith.constant 0 : i32
    %c0_i32_0 = arith.constant 0 : i32
    return %arg0, %c0_i32 : i32, i32
  }
  func.func @transform_1(%arg0: i32) -> (i32, i32) {
    %c0_i32 = arith.constant 0 : i32
    %c0_i32_0 = arith.constant 0 : i32
    %c0_i32_1 = arith.constant 0 : i32
    return %c0_i32, %c0_i32_0 : i32, i32
  }
  func.func @transform_2(%arg0: i32) -> (i32, i32) {
    %c0_i32 = arith.constant 0 : i32
    %c0_i32_0 = arith.constant 0 : i32
    %c0_i32_1 = arith.constant 0 : i32
    return %c0_i32, %c0_i32_0 : i32, i32
  }
  func.func @transform_3(%arg0: i32) -> (i32, i32) {
    %c0_i32 = arith.constant 0 : i32
    %c0_i32_0 = arith.constant 0 : i32
    return %arg0, %c0_i32 : i32, i32
  }
}

</mosaic_0001>

<bundles_post_ra>
// kernel: tpu_custom_call.1
= control target key start
LH: loop header
LB: loop body
LE: loop exit
PB: predicated region body
PF: predicated region fallthrough
CT: control target
= control target key end

     0   :  { %8 = vsyncpa [#allocation3], 0  ;;  %s3295_s0 = inlined_call_operand.hbm [shape: f32[4,128], index: 0, kind: input, shape index: {}]   ;;  %s3296_s1 = inlined_call_operand.hbm [shape: f32[128,640], index: 1, kind: input, shape index: {}]   ;;  %s3297_s2 = inlined_call_operand.hbm [shape: f32[1,640], index: 2, kind: input, shape index: {}]   ;;  %s3298_s3 = inlined_call_operand.hbm [shape: f32[4,640], index: 3, kind: output, shape index: {}]  }
   0x1   :  { %9 = vsyncpa [#allocation6], 0  ;;  %s26_s14 = sshll.u32 %s3296_s1, 4  ;;  %s27_s14 = int_to_ptr.hbm [resolvable:$true] %s26_s14 }
   0x2   :  { %10 = vsyncpa [#allocation4], 0  ;;  %s2006_s15 = smov [#allocation5]   ;;  %s16_s19 = sshll.u32 %s3295_s0, 4  ;;  %s17_s19 = int_to_ptr.hbm [resolvable:$true] %s16_s19 }
   0x3   :  { %s28_s16 = sshll.u32 %s2006_s15, 4  ;;  %s2007_s20 = smov 640   ;;  %s29_s16 = int_to_ptr.vmem [resolvable:$true] %s28_s16 }
   0x4   :  { %s2008_s21 = smov 40   ;;  %s2009_s22 = smov [#allocation2]  }
   0x5   :  { %34 = dma.hbm_to_vmem [thread:$0]  %s27_s14, 10240, %s29_s16, [#allocation6], %s2007_s20, %s2007_s20, %s2008_s21  }
   0x6   :  { %s18_s23 = sshll.u32 %s2009_s22, 4  ;;  %s40_s26 = sshll.u32 %s3297_s2, 4  ;;  %s19_s23 = int_to_ptr.vmem [resolvable:$true] %s18_s23  ;;  %s41_s26 = int_to_ptr.hbm [resolvable:$true] %s40_s26 }
   0x7   :  { %21 = dma.hbm_to_vmem [thread:$0]  %s17_s19, 64, %s19_s23, [#allocation3]  }
   0x8   :  { %s2010_s1 = smov [#allocation7]  }
   0x9   :  { %s42_s27 = sshll.u32 %s2010_s1, 4  ;;  %s43_s27 = int_to_ptr.vmem [resolvable:$true] %s42_s27 }
   0xa   :  { %45 = dma.hbm_to_vmem [thread:$0]  %s41_s26, 80, %s43_s27, [#allocation6]  }
   0xb   :  { %2000 = dma.done.wait [#allocation3], 64  }
   0xc   :  { %2001 = vsyncadd [#allocation3], 4294967232 }
   0xd   :  { %2002 = dma.done.wait [#allocation6], 10320  }
   0xe   :  { %2003 = vsyncadd [#allocation6], 4294956976  ;;  %v134_v0 = vld [vmem:[#allocation5 + $0x258] sm:$0xff]  ;;  %v129_v1 = vld [vmem:[#allocation5 + $0x230] sm:$0xff]  ;;  %vm1872_vm0 = vcmask 1043456   ;;  %s2011_s0 = smov [#allocation8]  }
   0xf   :  { %v124_v2 = vld [vmem:[#allocation5 + $0x208] sm:$0xff]  ;;  %v2041_v3 = vand.u32 4294901760, %v134_v0  ;;  %v2043_v4 = vand.u32 4294901760, %v129_v1  ;;  %v119_v6 = vld [vmem:[#allocation5 + $0x1e0] sm:$0xff]  ;;  %v114_v7 = vld [vmem:[#allocation5 + $0x1b8] sm:$0xff]  ;;  %s1885_s2 = sshll.u32 %s2011_s0, 4  ;;  %s1886_s2 = int_to_ptr.vmem [resolvable:$true] %s1885_s2 }
  0x10   :  { %v2045_v5 = vand.u32 4294901760, %v124_v2  ;;  %v109_v8 = vld [vmem:[#allocation5 + $0x190] sm:$0xff]  ;;  %v2047_v9 = vand.u32 4294901760, %v119_v6  ;;  %v2049_v10 = vand.u32 4294901760, %v114_v7  ;;  %v104_v12 = vld [vmem:[#allocation5 + $0x168] sm:$0xff]  ;;  %v99_v13 = vld [vmem:[#allocation5 + $0x140] sm:$0xff] }
  0x11   :  { %v2051_v11 = vand.u32 4294901760, %v109_v8  ;;  %140 = vmatpush.msra.mxu0 %v2041_v3  ;;  %v2055_v14 = vsub.f32 %v134_v0, %v2041_v3  ;;  %v2058_v15 = vsub.f32 %v129_v1, %v2043_v4  ;;  %336 = vmatpush.msra.mxu3 %v2041_v3  ;;  %v2064_v17 = vand.u32 4294901760, %v104_v12  ;;  %v94_v21 = vld [vmem:[#allocation5 + $0x118] sm:$0xff]  ;;  %v89_v34 = vld [vmem:[#allocation5 + $0xf0] sm:$0xff]  ;;  %v84_v35 = vld [vmem:[#allocation5 + $0xc8] sm:$0xff]  ;;  %s1887_s30 = sshll.u32 %s3298_s3, 4  ;;  %s1888_s30 = int_to_ptr.hbm [resolvable:$true] %s1887_s30 }
  0x12   :  { %v2062_v16 = vsub.f32 %v124_v2, %v2045_v5  ;;  %v2067_v18 = vsub.f32 %v119_v6, %v2047_v9  ;;  %v2070_v19 = vsub.f32 %v114_v7, %v2049_v10  ;;  %v2080_v25 = vand.u32 4294901760, %v99_v13  ;;  %v79_v40 = vld [vmem:[#allocation5 + $0xa0] sm:$0xff]  ;;  %v74_v48 = vld [vmem:[#allocation5 + $0x78] sm:$0xff]  ;;  %v69_v53 = vld [vmem:[#allocation5 + $0x50] sm:$0xff] }
  0x13   :  { %v2073_v20 = vsub.f32 %v109_v8, %v2051_v11  ;;  %283 = vmatpush.msra.mxu2 %v2055_v14  ;;  %142 = vmatpush.msra.mxu0 %v2043_v4  ;;  %v3313_v22 = vand.u32 4294901760, %v2055_v14  ;;  %v3312_v23 = vand.u32 4294901760, %v2058_v15  ;;  %v2086_v28 = vsub.f32 %v104_v12, %v2064_v17  ;;  %v135_v55 = vld [vmem:[#allocation5 + $0x260] sm:$0xff]  ;;  %v64_v60 = vld [vmem:[#allocation5 + $0x28] sm:$0xff]  ;;  %v130_v63 = vld [vmem:[#allocation5 + $0x238] sm:$0xff] }
  0x14   :  { %v3311_v24 = vand.u32 4294901760, %v2062_v16  ;;  %338 = vmatpush.msra.mxu3 %v2043_v4  ;;  %v3308_v26 = vand.u32 4294901760, %v2067_v18  ;;  %v3307_v27 = vand.u32 4294901760, %v2070_v19  ;;  %v2099_v32 = vand.u32 4294901760, %v94_v21  ;;  %v59_v6 = vld [vmem:[#allocation5] sm:$0xff] }
  0x15   :  { %286 = vmatpush.msra.mxu2 %v2058_v15  ;;  %144 = vmatpush.msra.mxu0 %v2045_v5  ;;  %v183_v29 = vsub.f32 %v2055_v14, %v3313_v22  ;;  %v189_v30 = vsub.f32 %v2058_v15, %v3312_v23  ;;  %v3305_v33 = vand.u32 4294901760, %v2073_v20  ;;  %v2109_v39 = vsub.f32 %v99_v13, %v2080_v25  ;;  %v125_v13 = vld [vmem:[#allocation5 + $0x210] sm:$0xff] }
  0x16   :  { %v195_v31 = vsub.f32 %v2062_v16, %v3311_v24  ;;  %340 = vmatpush.msra.mxu3 %v2045_v5  ;;  %v201_v38 = vsub.f32 %v2067_v18, %v3308_v26  ;;  %v207_v41 = vsub.f32 %v2070_v19, %v3307_v27  ;;  %v2116_v42 = vsub.f32 %v94_v21, %v2099_v32 }
  0x17   :  { %v184_v36 = vand.u32 4294901760, %v183_v29  ;;  %289 = vmatpush.msra.mxu2 %v2062_v16  ;;  %146 = vmatpush.msra.mxu0 %v2047_v9  ;;  %v190_v37 = vand.u32 4294901760, %v189_v30  ;;  %v3304_v44 = vand.u32 4294901760, %v2086_v28  ;;  %v2120_v45 = vand.u32 4294901760, %v89_v34 }
  0x18   :  { %342 = vmatpush.msra.mxu3 %v2047_v9  ;;  %v196_v43 = vand.u32 4294901760, %v195_v31  ;;  %v2122_v46 = vand.u32 4294901760, %v84_v35  ;;  %v2126_v47 = vand.u32 4294901760, %v79_v40  ;;  %v202_v49 = vand.u32 4294901760, %v201_v38 }
  0x19   :  { %185 = vmatpush.msra.mxu1 %v184_v36  ;;  %292 = vmatpush.msra.mxu2 %v2067_v18  ;;  %v213_v50 = vsub.f32 %v2073_v20, %v3305_v33  ;;  %v3303_v51 = vand.u32 4294901760, %v2109_v39  ;;  %v2134_v52 = vsub.f32 %v89_v34, %v2120_v45  ;;  %v3301_v54 = vand.u32 4294901760, %v2116_v42  ;;  %v100_v33 = vld [vmem:[#allocation5 + $0x148] sm:$0xff] }
  0x1a   :  { %148 = vmatpush.msra.mxu0 %v2049_v10  ;;  %344 = vmatpush.msra.mxu3 %v2049_v10  ;;  %v208_v56 = vand.u32 4294901760, %v207_v41  ;;  %v219_v57 = vsub.f32 %v2086_v28, %v3304_v44  ;;  %v2144_v58 = vsub.f32 %v84_v35, %v2122_v46  ;;  %v2146_v59 = vand.u32 4294901760, %v74_v48 }
  0x1b   :  { %191 = vmatpush.msra.mxu1 %v190_v37  ;;  %295 = vmatpush.msra.mxu2 %v2070_v19  ;;  %v2151_v61 = vsub.f32 %v79_v40, %v2126_v47  ;;  %v2153_v62 = vand.u32 4294901760, %v69_v53  ;;  %v214_v0 = vand.u32 4294901760, %v213_v50  ;;  %v225_v1 = vsub.f32 %v2109_v39, %v3303_v51  ;;  %v120_v37 = vld [vmem:[#allocation5 + $0x1e8] sm:$0xff]  ;;  %v115_v50 = vld [vmem:[#allocation5 + $0x1c0] sm:$0xff] }
  0x1c   :  { %150 = vmatpush.msra.mxu0 %v2051_v11  ;;  %346 = vmatpush.msra.mxu3 %v2051_v11  ;;  %v3300_v2 = vand.u32 4294901760, %v2134_v52  ;;  %v2160_v7 = vand.u32 4294901760, %v135_v55  ;;  %v231_v8 = vsub.f32 %v2116_v42, %v3301_v54  ;;  %v2167_v12 = vand.u32 4294901760, %v64_v60  ;;  %v105_v54 = vld [vmem:[#allocation5 + $0x170] sm:$0xff] }
  0x1d   :  { %197 = vmatpush.msra.mxu1 %v196_v43  ;;  %298 = vmatpush.msra.mxu2 %v2073_v20  ;;  %v220_v21 = vand.u32 4294901760, %v219_v57  ;;  %v3299_v29 = vand.u32 4294901760, %v2144_v58  ;;  %v2172_v30 = vsub.f32 %v74_v48, %v2146_v59  ;;  %v2174_v31 = vand.u32 4294901760, %v130_v63 }
  0x1e   :  { %152 = vmatpush.msra.mxu0 %v2064_v17  ;;  %348 = vmatpush.msra.mxu3 %v2064_v17  ;;  %3362 = vst [vmem:[#allocation12_spill] sm:$0xff] %v2167_v12  ;;  %v3302_v34 = vand.u32 4294901760, %v2151_v61  ;;  %v2180_v35 = vsub.f32 %v69_v53, %v2153_v62  ;;  %v2182_v36 = vand.u32 4294901760, %v59_v6  ;;  %v226_v38 = vand.u32 4294901760, %v225_v1 }
  0x1f   :  { %203 = vmatpush.msra.mxu1 %v202_v49  ;;  %301 = vmatpush.msra.mxu2 %v2086_v28  ;;  %v237_v40 = vsub.f32 %v2134_v52, %v3300_v2  ;;  %v2189_v41 = vsub.f32 %v135_v55, %v2160_v7  ;;  %v2191_v43 = vand.u32 4294901760, %v125_v13  ;;  %v232_v48 = vand.u32 4294901760, %v231_v8 }
  0x20   :  { %154 = vmatpush.msra.mxu0 %v2080_v25  ;;  %350 = vmatpush.msra.mxu3 %v2080_v25  ;;  %3363 = vst [vmem:[#allocation13_spill] sm:$0xff] %v2182_v36  ;;  %v2196_v49 = vsub.f32 %v64_v60, %v2167_v12  ;;  %v243_v53 = vsub.f32 %v2144_v58, %v3299_v29  ;;  %v3306_v55 = vand.u32 4294901760, %v2172_v30  ;;  %v2206_v57 = vand.u32 4294901760, %v120_v37 }
  0x21   :  { %209 = vmatpush.msra.mxu1 %v208_v56  ;;  %304 = vmatpush.msra.mxu2 %v2109_v39  ;;  %v2204_v56 = vsub.f32 %v130_v63, %v2174_v31  ;;  %v249_v60 = vsub.f32 %v2151_v61, %v3302_v34  ;;  %v3309_v1 = vand.u32 4294901760, %v2180_v35  ;;  %v2215_v8 = vsub.f32 %v59_v6, %v2182_v36 }
  0x22   :  { %156 = vmatpush.msra.mxu0 %v2099_v32  ;;  %352 = vmatpush.msra.mxu3 %v2099_v32  ;;  %v238_v63 = vand.u32 4294901760, %v237_v40  ;;  %v2220_v29 = vsub.f32 %v125_v13, %v2191_v43  ;;  %v2222_v2 = vand.u32 4294901760, %v115_v50  ;;  %v3315_v34 = vand.u32 4294901760, %v2196_v49 }
  0x23   :  { %215 = vmatpush.msra.mxu1 %v214_v0  ;;  %307 = vmatpush.msra.mxu2 %v2116_v42  ;;  %3364 = vst [vmem:[#allocation14_spill] sm:$0xff] %v2204_v56  ;;  %v110_v0 = vld [vmem:[#allocation5 + $0x198] sm:$0xff]  ;;  %v255_v13 = vsub.f32 %v2172_v30, %v3306_v55  ;;  %v3314_v40 = vand.u32 4294901760, %v2204_v56  ;;  %v2235_v51 = vsub.f32 %v120_v37, %v2206_v57  ;;  %v3318_v44 = vand.u32 4294901760, %v2215_v8 }
  0x24   :  { %158 = vmatpush.msra.mxu0 %v2120_v45  ;;  %354 = vmatpush.msra.mxu3 %v2120_v45  ;;  %3365 = vst [vmem:[#allocation15_spill] sm:$0xff] %v2220_v29  ;;  %v2227_v6 = vand.u32 4294901760, %v110_v0  ;;  %v250_v55 = vand.u32 4294901760, %v249_v60  ;;  %v3319_v27 = vand.u32 4294901760, %v2220_v29  ;;  %v2251_v26 = vsub.f32 %v115_v50, %v2222_v2  ;;  %v95_v60 = vld [vmem:[#allocation5 + $0x120] sm:$0xff] }
  0x25   :  { %221 = vmatpush.msra.mxu1 %v220_v21  ;;  %310 = vmatpush.msra.mxu2 %v2134_v52  ;;  %v3310_v21 = vand.u32 4294901760, %v2189_v41  ;;  %3366 = vst [vmem:[#allocation16_spill] sm:$0xff] %v2235_v51  ;;  %v530_v50 = vsub.f32 %v2204_v56, %v3314_v40  ;;  %v2266_v23 = vand.u32 4294901760, %v100_v33  ;;  %v2281_v24 = vand.u32 4294901760, %v95_v60 }
  0x26   :  { %160 = vmatpush.msra.mxu0 %v2122_v46  ;;  %356 = vmatpush.msra.mxu3 %v2122_v46 }
  0x27   :  { %227 = vmatpush.msra.mxu1 %v226_v38  ;;  %313 = vmatpush.msra.mxu2 %v2144_v58  ;;  %v244_v38 = vand.u32 4294901760, %v243_v53  ;;  %v2243_v53 = vand.u32 4294901760, %v105_v54  ;;  %v524_v37 = vsub.f32 %v2189_v41, %v3310_v21  ;;  %v256_v21 = vand.u32 4294901760, %v255_v13  ;;  %v90_v13 = vld [vmem:[#allocation5 + $0xf8] sm:$0xff] }
  0x28   :  { %162 = vmatpush.msra.mxu0 %v2126_v47  ;;  %358 = vmatpush.msra.mxu3 %v2126_v47 }
  0x29   :  { %233 = vmatpush.msra.mxu1 %v232_v48  ;;  %316 = vmatpush.msra.mxu2 %v2151_v61  ;;  %v261_v48 = vsub.f32 %v2180_v35, %v3309_v1  ;;  %v2259_v1 = vsub.f32 %v110_v0, %v2227_v6  ;;  %v273_v0 = vsub.f32 %v2215_v8, %v3318_v44  ;;  %v525_v40 = vand.u32 4294901760, %v524_v37  ;;  %v85_v44 = vld [vmem:[#allocation5 + $0xd0] sm:$0xff] }
  0x2a   :  { %164 = vmatpush.msra.mxu0 %v2146_v59  ;;  %360 = vmatpush.msra.mxu3 %v2146_v59  ;;  %v3367_v37 = vand.u32 4294901760, %v2235_v51 }
  0x2b   :  { %239 = vmatpush.msra.mxu1 %v238_v63  ;;  %319 = vmatpush.msra.mxu2 %v2172_v30  ;;  %v267_v63 = vsub.f32 %v2196_v49, %v3315_v34  ;;  %v262_v22 = vand.u32 4294901760, %v261_v48  ;;  %v536_v34 = vsub.f32 %v2220_v29, %v3319_v27  ;;  %v2291_v48 = vsub.f32 %v100_v33, %v2266_v23 }
  0x2c   :  { %166 = vmatpush.msra.mxu0 %v2153_v62  ;;  %362 = vmatpush.msra.mxu3 %v2153_v62  ;;  %v542_v27 = vsub.f32 %v2235_v51, %v3367_v37  ;;  %v2293_v29 = vand.u32 4294901760, %v90_v13  ;;  %v2303_v33 = vsub.f32 %v95_v60, %v2281_v24  ;;  %v2305_v51 = vand.u32 4294901760, %v85_v44 }
  0x2d   :  { %245 = vmatpush.msra.mxu1 %v244_v38  ;;  %322 = vmatpush.msra.mxu2 %v2180_v35  ;;  %v2274_v38 = vsub.f32 %v105_v54, %v2243_v53  ;;  %v268_v56 = vand.u32 4294901760, %v267_v63  ;;  %v3368_v63 = vand.u32 4294901760, %v2055_v14  ;;  %v274_v54 = vand.u32 4294901760, %v273_v0 }
  0x2e   :  { %168 = vmatpush.msra.mxu0 %v2167_v12  ;;  %364 = vmatpush.msra.mxu3 %v2167_v12  ;;  %v3369_v12 = vand.u32 4294901760, %v2251_v26  ;;  %v3370_v14 = vand.u32 4294901760, %v2058_v15  ;;  %v3371_v0 = vand.u32 4294901760, %v2259_v1  ;;  %v2315_v60 = vsub.f32 %v90_v13, %v2293_v29 }
  0x2f   :  { %251 = vmatpush.msra.mxu1 %v250_v55  ;;  %325 = vmatpush.msra.mxu2 %v2196_v49  ;;  %v531_v55 = vand.u32 4294901760, %v530_v50  ;;  %v537_v50 = vand.u32 4294901760, %v536_v34  ;;  %v543_v34 = vand.u32 4294901760, %v542_v27  ;;  %v3372_v15 = vand.u32 4294901760, %v2062_v16 }
  0x30   :  { %170 = vmatpush.msra.mxu0 %v2182_v36  ;;  %366 = vmatpush.msra.mxu3 %v2182_v36  ;;  %v80_v36 = vld [vmem:[#allocation5 + $0xa8] sm:$0xff]  ;;  %v548_v37 = vsub.f32 %v2251_v26, %v3369_v12  ;;  %v2327_v13 = vsub.f32 %v85_v44, %v2305_v51  ;;  %v3373_v16 = vand.u32 4294901760, %v2067_v18  ;;  %v65_v12 = vld [vmem:[#allocation5 + $0x30] sm:$0xff] }
  0x31   :  { %257 = vmatpush.msra.mxu1 %v256_v21  ;;  %328 = vmatpush.msra.mxu2 %v2215_v8  ;;  %v3326_v21 = vand.u32 4294901760, %v2274_v38 }
  0x32   :  { %377 = vmatpush.msrb.mxu0 %v3368_v63  ;;  %526 = vmatpush.msrb.mxu3 %v525_v40  ;;  %v75_v40 = vld [vmem:[#allocation5 + $0x80] sm:$0xff]  ;;  %v2317_v63 = vand.u32 4294901760, %v80_v36  ;;  %v549_v27 = vand.u32 4294901760, %v548_v37  ;;  %v577_v37 = vand.u32 4294901760, %v2315_v60 }
  0x33   :  { %481 = vmatpush.msrb.mxu2 %v2160_v7  ;;  %263 = vmatpush.msra.mxu1 %v262_v22  ;;  %v554_v22 = vsub.f32 %v2259_v1, %v3371_v0  ;;  %v70_v0 = vld [vmem:[#allocation5 + $0x58] sm:$0xff] }
  0x34   :  { %381 = vmatpush.msrb.mxu0 %v3370_v14  ;;  %532 = vmatpush.msrb.mxu3 %v531_v55  ;;  %v560_v14 = vsub.f32 %v2274_v38, %v3326_v21  ;;  %v2329_v55 = vand.u32 4294901760, %v75_v40  ;;  %v2340_v44 = vsub.f32 %v80_v36, %v2317_v63  ;;  %v2342_v21 = vand.u32 4294901760, %v70_v0 }
  0x35   :  { %483 = vmatpush.msrb.mxu2 %v2174_v31  ;;  %269 = vmatpush.msra.mxu1 %v268_v56  ;;  %v571_v56 = vand.u32 4294901760, %v2303_v33 }
  0x36   :  { %385 = vmatpush.msrb.mxu0 %v3372_v15  ;;  %538 = vmatpush.msrb.mxu3 %v537_v50  ;;  %v555_v15 = vand.u32 4294901760, %v554_v22  ;;  %v561_v18 = vand.u32 4294901760, %v560_v14  ;;  %v2353_v36 = vsub.f32 %v75_v40, %v2329_v55  ;;  %v578_v14 = vsub.f32 %v2315_v60, %v577_v37 }
  0x37   :  { %485 = vmatpush.msrb.mxu2 %v2191_v43  ;;  %275 = vmatpush.msra.mxu1 %v274_v54  ;;  %v3374_v54 = vand.u32 4294901760, %v2291_v48  ;;  %v572_v22 = vsub.f32 %v2303_v33, %v571_v56  ;;  %v2366_v40 = vsub.f32 %v70_v0, %v2342_v21 }
  0x38   :  { %389 = vmatpush.msrb.mxu0 %v3373_v16  ;;  %544 = vmatpush.msrb.mxu3 %v543_v34  ;;  %v583_v34 = vand.u32 4294901760, %v2327_v13  ;;  %v2355_v16 = vand.u32 4294901760, %v65_v12 }
  0x39   :  { %444 = vmatpush.msrb.mxu1 %v2041_v3  ;;  %487 = vmatpush.msrb.mxu2 %v2206_v57  ;;  %v566_v50 = vsub.f32 %v2291_v48, %v3374_v54  ;;  %v3375_v3 = vand.u32 4294901760, %v2070_v19  ;;  %v58_v54 = vld [vmem:[#allocation2] sm:$0xf] }
  0x3a   :  { %550 = vmatpush.msrb.mxu3 %v549_v27  ;;  %v589_v27 = vand.u32 4294901760, %v2340_v44  ;;  %v2379_v0 = vsub.f32 %v65_v12, %v2355_v16  ;;  %v3380_v12 = vand.u32 4294901760, %v2116_v42 }
  0x3b   :  { %446 = vmatpush.msrb.mxu1 %v2043_v4  ;;  %393 = vmatpush.msrb.mxu0 %v3375_v3  ;;  %v3376_v4 = vand.u32 4294901760, %v2073_v20  ;;  %v567_v19 = vand.u32 4294901760, %v566_v50  ;;  %v2371_v20 = vand.u32 4294901760, %v58_v54  ;;  %v60_v3 = vld [vmem:[#allocation5 + $0x8] sm:$0xff]  ;;  %v584_v50 = vsub.f32 %v2327_v13, %v583_v34 }
  0x3c   :  { %489 = vmatpush.msrb.mxu2 %v2222_v2  ;;  %556 = vmatpush.msrb.mxu3 %v555_v15  ;;  %v573_v15 = vand.u32 4294901760, %v572_v22  ;;  %v601_v22 = vand.u32 4294901760, %v2366_v40 }
  0x3d   :  { %448 = vmatpush.msrb.mxu1 %v2045_v5  ;;  %397 = vmatpush.msrb.mxu0 %v3376_v4  ;;  %v3377_v5 = vand.u32 4294901760, %v2086_v28  ;;  %3378 = vst [vmem:[#allocation17_spill] sm:$0xff] %v2371_v20  ;;  %v595_v4 = vand.u32 4294901760, %v2353_v36  ;;  %v579_v28 = vand.u32 4294901760, %v578_v14  ;;  %v607_v14 = vand.u32 4294901760, %v2379_v0 }
  0x3e   :  { %491 = vmatpush.msrb.mxu2 %v2227_v6  ;;  %562 = vmatpush.msrb.mxu3 %v561_v18  ;;  %v590_v18 = vsub.f32 %v2340_v44, %v589_v27 }
  0x3f   :  { %450 = vmatpush.msrb.mxu1 %v2047_v9  ;;  %401 = vmatpush.msrb.mxu0 %v3377_v5  ;;  %v3379_v9 = vand.u32 4294901760, %v2109_v39  ;;  %v2389_v5 = vand.u32 4294901760, %v60_v3  ;;  %v585_v39 = vand.u32 4294901760, %v584_v50  ;;  %v3382_v50 = vand.u32 4294901760, %v2144_v58 }
  0x40   :  { %493 = vmatpush.msrb.mxu2 %v2243_v53  ;;  %568 = vmatpush.msrb.mxu3 %v567_v19  ;;  %v596_v19 = vsub.f32 %v2353_v36, %v595_v4  ;;  %v591_v42 = vand.u32 4294901760, %v590_v18 }
  0x41   :  { %452 = vmatpush.msrb.mxu1 %v2049_v10  ;;  %405 = vmatpush.msrb.mxu0 %v3379_v9  ;;  %v2395_v10 = vsub.f32 %v58_v54, %v2371_v20  ;;  %v602_v54 = vsub.f32 %v2366_v40, %v601_v22  ;;  %v608_v9 = vsub.f32 %v2379_v0, %v607_v14 }
  0x42   :  { %495 = vmatpush.msrb.mxu2 %v2266_v23  ;;  %574 = vmatpush.msrb.mxu3 %v573_v15  ;;  %v2410_v15 = vsub.f32 %v60_v3, %v2389_v5  ;;  %v3383_v3 = vand.u32 4294901760, %v2151_v61  ;;  %v3385_v61 = vand.u32 4294901760, %v2180_v35 }
  0x43   :  { %454 = vmatpush.msrb.mxu1 %v2051_v11  ;;  %409 = vmatpush.msrb.mxu0 %v3380_v12  ;;  %v3381_v11 = vand.u32 4294901760, %v2134_v52  ;;  %v597_v52 = vand.u32 4294901760, %v596_v19  ;;  %v3395_v19 = vld [vmem:[#allocation16_spill] sm:$0xff] }
  0x44   :  { %497 = vmatpush.msrb.mxu2 %v2281_v24  ;;  %580 = vmatpush.msrb.mxu3 %v579_v28  ;;  %v613_v58 = vand.u32 4294901760, %v2410_v15  ;;  %v3384_v28 = vand.u32 4294901760, %v2172_v30  ;;  %v3386_v30 = vand.u32 4294901760, %v2196_v49  ;;  %v3390_v49 = vld [vmem:[#allocation14_spill] sm:$0xff] }
  0x45   :  { %456 = vmatpush.msrb.mxu1 %v2064_v17  ;;  %413 = vmatpush.msrb.mxu0 %v3381_v11  ;;  %v2416_v17 = vand.u32 4294901760, %v2395_v10  ;;  %v3396_v11 = vand.u32 4294901760, %v3395_v19 }
  0x46   :  { %499 = vmatpush.msrb.mxu2 %v2293_v29  ;;  %586 = vmatpush.msrb.mxu3 %v585_v39  ;;  %v3393_v39 = vld [vmem:[#allocation15_spill] sm:$0xff] }
  0x47   :  { %458 = vmatpush.msrb.mxu1 %v2080_v25  ;;  %417 = vmatpush.msrb.mxu0 %v3382_v50  ;;  %v603_v25 = vand.u32 4294901760, %v602_v54  ;;  %v174_v18 = vsub.f32 %v2395_v10, %v2416_v17  ;;  %v91_v54 = vld [vmem:[#allocation5 + $0x100] sm:$0xff] }
  0x48   :  { %501 = vmatpush.msrb.mxu2 %v2305_v51  ;;  %592 = vmatpush.msrb.mxu3 %v591_v42 }
  0x49   :  { %460 = vmatpush.msrb.mxu1 %v2099_v32  ;;  %421 = vmatpush.msrb.mxu0 %v3383_v3  ;;  %v609_v32 = vand.u32 4294901760, %v608_v9  ;;  %v2443_v12 = vand.u32 4294901760, %v174_v18  ;;  %v86_v3 = vld [vmem:[#allocation5 + $0xd8] sm:$0xff] }
  0x4a   :  { %503 = vmatpush.msrb.mxu2 %v2317_v63  ;;  %598 = vmatpush.msrb.mxu3 %v597_v52 }
  0x4b   :  { %462 = vmatpush.msrb.mxu1 %v2120_v45  ;;  %425 = vmatpush.msrb.mxu0 %v3384_v28  ;;  %v614_v45 = vsub.f32 %v2410_v15, %v613_v58 }
  0x4c   :  { %505 = vmatpush.msrb.mxu2 %v2329_v55  ;;  %604 = vmatpush.msrb.mxu3 %v603_v25  ;;  %v2601_v25 = vand.u32 4294901760, %v91_v54 }
  0x4d   :  { %464 = vmatpush.msrb.mxu1 %v2122_v46  ;;  %429 = vmatpush.msrb.mxu0 %v3385_v61  ;;  %v3387_v46 = vand.u32 4294901760, %v2215_v8  ;;  %v615_v35 = vand.u32 4294901760, %v614_v45  ;;  %v3391_v8 = vand.u32 4294901760, %v3390_v49  ;;  %v2614_v61 = vand.u32 4294901760, %v86_v3  ;;  %v81_v45 = vld [vmem:[#allocation5 + $0xb0] sm:$0xff] }
  0x4e   :  { %507 = vmatpush.msrb.mxu2 %v2342_v21  ;;  %610 = vmatpush.msrb.mxu3 %v609_v32 }
  0x4f   :  { %466 = vmatpush.msrb.mxu1 %v2126_v47  ;;  %433 = vmatpush.msrb.mxu0 %v3386_v30  ;;  %v3388_v47 = vand.u32 4294901760, %v2189_v41 }
  0x50   :  { %509 = vmatpush.msrb.mxu2 %v2355_v16  ;;  %176 = vmatmul.f32.vlgmr.msra.gmra.mxu0 %v2443_v12 }
  0x51   :  { %468 = vmatpush.msrb.mxu1 %v2146_v59  ;;  %331 = vmatmul.f32.vlgmr.msra.gmra.mxu2 %v2395_v10  ;;  %v3389_v59 = vld [vmem:[#allocation12_spill] sm:$0xff] }
  0x52   :  { %437 = vmatpush.msrb.mxu0 %v3387_v46  ;;  %511 = vmatpush.msrb.mxu2 %v2389_v5 }
  0x53   :  { %470 = vmatpush.msrb.mxu1 %v2153_v62  ;;  %370 = vmatmul.f32.vlgmr.msra.gmra.mxu3 %v2416_v17  ;;  %v3392_v62 = vld [vmem:[#allocation13_spill] sm:$0xff] }
  0x54   :  { %624 = vmatpush.msra.mxu0 %v2189_v41  ;;  %718 = vmatpush.msra.mxu2 %v3388_v47  ;;  %v3394_v41 = vand.u32 4294901760, %v3393_v39  ;;  %v2627_v47 = vsub.f32 %v91_v54, %v2601_v25 }
  0x55   :  { %472 = vmatpush.msrb.mxu1 %v3389_v59  ;;  %616 = vmatpush.msrb.mxu3 %v615_v35  ;;  %v76_v59 = vld [vmem:[#allocation5 + $0x88] sm:$0xff] }
  0x56   :  { %277 = vmatmul.f32.vlgmr.msra.gmra.mxu1 %v2371_v20  ;;  %627 = vmatpush.msra.mxu0 %v3390_v49 }
  0x57   :  { %722 = vmatpush.msra.mxu2 %v3391_v8  ;;  %785 = vmatpush.msra.mxu3 %v2160_v7 }
  0x58   :  { %474 = vmatpush.msrb.mxu1 %v3392_v62  ;;  %630 = vmatpush.msra.mxu0 %v3393_v39  ;;  %v2634_v39 = vand.u32 4294901760, %v81_v45 }
  0x59   :  { %726 = vmatpush.msra.mxu2 %v3394_v41  ;;  %787 = vmatpush.msra.mxu3 %v2174_v31  ;;  %v2639_v41 = vsub.f32 %v86_v3, %v2614_v61  ;;  %v132_v3 = vld [vmem:[#allocation5 + $0x248] sm:$0xff] }
  0x5a   :  { %677 = vmatpush.msra.mxu1 %v2160_v7  ;;  %633 = vmatpush.msra.mxu0 %v3395_v19  ;;  %v3397_v7 = vand.u32 4294901760, %v2251_v26  ;;  %v71_v19 = vld [vmem:[#allocation5 + $0x60] sm:$0xff] }
  0x5b   :  { %730 = vmatpush.msra.mxu2 %v3396_v11  ;;  %789 = vmatpush.msra.mxu3 %v2191_v43 }
  0x5c   :  { %679 = vmatpush.msra.mxu1 %v2174_v31  ;;  %439 = vmatmul.f32.vlgmr.msrb.gmra.mxu0 %v2371_v20  ;;  %v3398_v31 = vand.u32 4294901760, %v2259_v1 }
  0x5d   :  { %636 = vmatpush.msra.mxu0 %v2251_v26  ;;  %734 = vmatpush.msra.mxu2 %v3397_v7  ;;  %v3399_v26 = vand.u32 4294901760, %v2274_v38 }
  0x5e   :  { %681 = vmatpush.msra.mxu1 %v2191_v43  ;;  %791 = vmatpush.msra.mxu3 %v2206_v57  ;;  %v3400_v43 = vand.u32 4294901760, %v2291_v48 }
  0x5f   :  { %476 = vmatmul.f32.vlgmr.msrb.gmra.mxu1 %v2371_v20  ;;  %639 = vmatpush.msra.mxu0 %v2259_v1  ;;  %v131_v1 = vld [vmem:[#allocation5 + $0x240] sm:$0xff] }
  0x60   :  { %683 = vmatpush.msra.mxu1 %v2206_v57  ;;  %738 = vmatpush.msra.mxu2 %v3398_v31  ;;  %v136_v57 = vld [vmem:[#allocation5 + $0x268] sm:$0xff] }
  0x61   :  { %793 = vmatpush.msra.mxu3 %v2222_v2  ;;  %642 = vmatpush.msra.mxu0 %v2274_v38 }
  0x62   :  { %685 = vmatpush.msra.mxu1 %v2222_v2  ;;  %742 = vmatpush.msra.mxu2 %v3399_v26  ;;  %v2506_v2 = vand.u32 4294901760, %v136_v57  ;;  %v2646_v26 = vand.u32 4294901760, %v76_v59 }
  0x63   :  { %795 = vmatpush.msra.mxu3 %v2227_v6  ;;  %645 = vmatpush.msra.mxu0 %v2291_v48 }
  0x64   :  { %687 = vmatpush.msra.mxu1 %v2227_v6  ;;  %746 = vmatpush.msra.mxu2 %v3400_v43  ;;  %v126_v6 = vld [vmem:[#allocation5 + $0x218] sm:$0xff]  ;;  %v3328_v43 = vand.u32 4294901760, %v2627_v47 }
  0x65   :  { %797 = vmatpush.msra.mxu3 %v2243_v53  ;;  %648 = vmatpush.msra.mxu0 %v2303_v33  ;;  %v2525_v38 = vand.u32 4294901760, %v126_v6 }
  0x66   :  { %689 = vmatpush.msra.mxu1 %v2243_v53  ;;  %750 = vmatpush.msra.mxu2 %v571_v56  ;;  %v2521_v53 = vsub.f32 %v136_v57, %v2506_v2  ;;  %v66_v57 = vld [vmem:[#allocation5 + $0x38] sm:$0xff] }
  0x67   :  { %799 = vmatpush.msra.mxu3 %v2266_v23  ;;  %651 = vmatpush.msra.mxu0 %v2315_v60  ;;  %v2544_v56 = vsub.f32 %v126_v6, %v2525_v38  ;;  %v2670_v54 = vand.u32 4294901760, %v66_v57 }
  0x68   :  { %691 = vmatpush.msra.mxu1 %v2266_v23  ;;  %754 = vmatpush.msra.mxu2 %v577_v37  ;;  %v2515_v23 = vand.u32 4294901760, %v131_v1  ;;  %v3343_v60 = vand.u32 4294901760, %v2521_v53  ;;  %v106_v37 = vld [vmem:[#allocation5 + $0x178] sm:$0xff] }
  0x69   :  { %801 = vmatpush.msra.mxu3 %v2281_v24  ;;  %654 = vmatpush.msra.mxu0 %v2327_v13 }
  0x6a   :  { %693 = vmatpush.msra.mxu1 %v2281_v24  ;;  %758 = vmatpush.msra.mxu2 %v583_v34  ;;  %v121_v24 = vld [vmem:[#allocation5 + $0x1f0] sm:$0xff]  ;;  %v2533_v48 = vsub.f32 %v131_v1, %v2515_v23 }
  0x6b   :  { %803 = vmatpush.msra.mxu3 %v2293_v29  ;;  %657 = vmatpush.msra.mxu0 %v2340_v44  ;;  %v2535_v33 = vand.u32 4294901760, %v121_v24 }
  0x6c   :  { %695 = vmatpush.msra.mxu1 %v2293_v29  ;;  %762 = vmatpush.msra.mxu2 %v589_v27  ;;  %v116_v29 = vld [vmem:[#allocation5 + $0x1c8] sm:$0xff]  ;;  %v3339_v27 = vand.u32 4294901760, %v2544_v56 }
  0x6d   :  { %805 = vmatpush.msra.mxu3 %v2305_v51  ;;  %517 = vmatmul.f32.vlgmr.msrb.gmra.mxu2 %v2443_v12  ;;  %v2546_v13 = vand.u32 4294901760, %v116_v29  ;;  %v2555_v44 = vsub.f32 %v121_v24, %v2535_v33  ;;  %v2656_v24 = vsub.f32 %v81_v45, %v2634_v39 }
  0x6e   :  { %660 = vmatpush.msra.mxu0 %v2353_v36  ;;  %697 = vmatpush.msra.mxu1 %v2305_v51  ;;  %v111_v51 = vld [vmem:[#allocation5 + $0x1a0] sm:$0xff]  ;;  %v101_v36 = vld [vmem:[#allocation5 + $0x150] sm:$0xff] }
  0x6f   :  { %766 = vmatpush.msra.mxu2 %v595_v4  ;;  %807 = vmatpush.msra.mxu3 %v2317_v63  ;;  %v2557_v34 = vand.u32 4294901760, %v111_v51  ;;  %v2571_v4 = vand.u32 4294901760, %v106_v37  ;;  %v2584_v42 = vand.u32 4294901760, %v101_v36 }
  0x70   :  { %663 = vmatpush.msra.mxu0 %v2366_v40  ;;  %618 = vmatmul.f32.vlgmr.msrb.gmra.mxu3 %v2371_v20  ;;  %v2569_v40 = vsub.f32 %v116_v29, %v2546_v13  ;;  %v2658_v29 = vand.u32 4294901760, %v71_v19 }
  0x71   :  { %699 = vmatpush.msra.mxu1 %v2317_v63  ;;  %770 = vmatpush.msra.mxu2 %v601_v22  ;;  %v3340_v63 = vand.u32 4294901760, %v2533_v48  ;;  %v3337_v22 = vand.u32 4294901760, %v2555_v44  ;;  %v2595_v52 = vsub.f32 %v106_v37, %v2571_v4  ;;  %v2610_v32 = vsub.f32 %v101_v36, %v2584_v42 }
  0x72   :  { %809 = vmatpush.msra.mxu3 %v2329_v55  ;;  %666 = vmatpush.msra.mxu0 %v2379_v0  ;;  %v3335_v50 = vand.u32 4294901760, %v2569_v40  ;;  %v3327_v37 = vand.u32 4294901760, %v2639_v41  ;;  %v2682_v45 = vsub.f32 %v71_v19, %v2658_v29  ;;  %v2694_v19 = vsub.f32 %v66_v57, %v2670_v54 }
  0x73   :  { %701 = vmatpush.msra.mxu1 %v2329_v55  ;;  %774 = vmatpush.msra.mxu2 %v607_v14  ;;  %v865_v55 = vsub.f32 %v2521_v53, %v3343_v60  ;;  %v871_v0 = vsub.f32 %v2533_v48, %v3340_v63  ;;  %v2582_v14 = vsub.f32 %v111_v51, %v2557_v34  ;;  %v3333_v46 = vand.u32 4294901760, %v2595_v52  ;;  %v137_v51 = vld [vmem:[#allocation5 + $0x270] sm:$0xff] }
  0x74   :  { %811 = vmatpush.msra.mxu3 %v2342_v21  ;;  %669 = vmatpush.msra.mxu0 %v2410_v15  ;;  %v883_v28 = vsub.f32 %v2555_v44, %v3337_v22  ;;  %v889_v30 = vsub.f32 %v2569_v40, %v3335_v50  ;;  %v3332_v62 = vand.u32 4294901760, %v2610_v32  ;;  %v3336_v57 = vand.u32 4294901760, %v2682_v45  ;;  %v107_v50 = vld [vmem:[#allocation5 + $0x180] sm:$0xff] }
  0x75   :  { %703 = vmatpush.msra.mxu1 %v2342_v21  ;;  %778 = vmatpush.msra.mxu2 %v613_v58  ;;  %v96_v21 = vld [vmem:[#allocation5 + $0x128] sm:$0xff]  ;;  %v866_v15 = vand.u32 4294901760, %v865_v55  ;;  %v872_v58 = vand.u32 4294901760, %v871_v0  ;;  %v3334_v18 = vand.u32 4294901760, %v2582_v14  ;;  %v901_v7 = vsub.f32 %v2595_v52, %v3333_v46  ;;  %v61_v55 = vld [vmem:[#allocation5 + $0x10] sm:$0xff] }
  0x76   :  { %813 = vmatpush.msra.mxu3 %v2355_v16  ;;  %780 = vmatmul.f32.vlgmr.msra.gmra.mxu2 %v2371_v20  ;;  %v2597_v9 = vand.u32 4294901760, %v96_v21  ;;  %v884_v49 = vand.u32 4294901760, %v883_v28  ;;  %v890_v11 = vand.u32 4294901760, %v889_v30  ;;  %v907_v6 = vsub.f32 %v2610_v32, %v3332_v62 }
  0x77   :  { %822 = vmatpush.msrb.mxu0 %v2506_v2  ;;  %965 = vmatpush.msrb.mxu2 %v2521_v53  ;;  %v895_v8 = vsub.f32 %v2582_v14, %v3334_v18  ;;  %v902_v36 = vand.u32 4294901760, %v901_v7  ;;  %v2668_v0 = vsub.f32 %v76_v59, %v2646_v26  ;;  %v3329_v28 = vand.u32 4294901760, %v2656_v24  ;;  %v127_v59 = vld [vmem:[#allocation5 + $0x220] sm:$0xff] }
  0x78   :  { %705 = vmatpush.msra.mxu1 %v2355_v16  ;;  %815 = vmatpush.msra.mxu3 %v2389_v5  ;;  %v877_v16 = vsub.f32 %v2544_v56, %v3339_v27  ;;  %v2622_v35 = vsub.f32 %v96_v21, %v2597_v9  ;;  %v925_v30 = vsub.f32 %v2639_v41, %v3327_v37  ;;  %v2711_v37 = vand.u32 4294901760, %v127_v59 }
  0x79   :  { %672 = vmatmul.f32.vlgmr.msra.gmra.mxu0 %v2395_v10  ;;  %817 = vmatmul.f32.vlgmr.msra.gmra.mxu3 %v2371_v20  ;;  %v896_v1 = vand.u32 4294901760, %v895_v8  ;;  %v3331_v8 = vand.u32 4294901760, %v2668_v0  ;;  %v2763_v63 = vand.u32 4294901760, %v107_v50  ;;  %v92_v20 = vld [vmem:[#allocation5 + $0x108] sm:$0xff] }
  0x7a   :  { %824 = vmatpush.msrb.mxu0 %v2515_v23  ;;  %968 = vmatpush.msrb.mxu2 %v2533_v48  ;;  %v3330_v31 = vand.u32 4294901760, %v2622_v35  ;;  %v2736_v46 = vsub.f32 %v127_v59, %v2711_v37 }
  0x7b   :  { %1018 = vmatpush.msrb.mxu3 %v2506_v2  ;;  %707 = vmatpush.msra.mxu1 %v2389_v5  ;;  %v878_v5 = vand.u32 4294901760, %v877_v16  ;;  %v2677_v16 = vand.u32 4294901760, %v137_v51 }
  0x7c   :  { %826 = vmatpush.msrb.mxu0 %v2525_v38  ;;  %711 = vmatmul.f32.vlgmr.msra.gmra.mxu1 %v2416_v17  ;;  %v913_v21 = vsub.f32 %v2622_v35, %v3330_v31  ;;  %v112_v31 = vld [vmem:[#allocation5 + $0x1a8] sm:$0xff]  ;;  %3403 = vst [vmem:[#allocation13_spill] sm:$0xff] %v2736_v46 }
  0x7d   :  { %971 = vmatpush.msrb.mxu2 %v2544_v56  ;;  %867 = vmatpush.msrb.mxu1 %v866_v15  ;;  %v919_v15 = vsub.f32 %v2627_v47, %v3328_v43  ;;  %v117_v43 = vld [vmem:[#allocation5 + $0x1d0] sm:$0xff]  ;;  %v2740_v18 = vand.u32 4294901760, %v112_v31 }
  0x7e   :  { %1020 = vmatpush.msrb.mxu3 %v2515_v23  ;;  %828 = vmatpush.msrb.mxu0 %v2535_v33 }
  0x7f   :  { %974 = vmatpush.msrb.mxu2 %v2555_v44  ;;  %873 = vmatpush.msrb.mxu1 %v872_v58  ;;  %v908_v58 = vand.u32 4294901760, %v907_v6  ;;  %v920_v7 = vand.u32 4294901760, %v919_v15  ;;  %v122_v6 = vld [vmem:[#allocation5 + $0x1f8] sm:$0xff]  ;;  %v937_v15 = vsub.f32 %v2668_v0, %v3331_v8 }
  0x80   :  { %1022 = vmatpush.msrb.mxu3 %v2525_v38  ;;  %830 = vmatpush.msrb.mxu0 %v2546_v13 }
  0x81   :  { %977 = vmatpush.msrb.mxu2 %v2569_v40  ;;  %879 = vmatpush.msrb.mxu1 %v878_v5  ;;  %v2684_v5 = vand.u32 4294901760, %v61_v55 }
  0x82   :  { %1024 = vmatpush.msrb.mxu3 %v2535_v33  ;;  %832 = vmatpush.msrb.mxu0 %v2557_v34 }
  0x83   :  { %980 = vmatpush.msrb.mxu2 %v2582_v14  ;;  %885 = vmatpush.msrb.mxu1 %v884_v49  ;;  %v914_v49 = vand.u32 4294901760, %v913_v21  ;;  %v2709_v21 = vsub.f32 %v61_v55, %v2684_v5 }
  0x84   :  { %1026 = vmatpush.msrb.mxu3 %v2546_v13  ;;  %834 = vmatpush.msrb.mxu0 %v2571_v4 }
  0x85   :  { %983 = vmatpush.msrb.mxu2 %v2595_v52  ;;  %891 = vmatpush.msrb.mxu1 %v890_v11  ;;  %v2696_v11 = vand.u32 4294901760, %v132_v3  ;;  %v3342_v62 = vand.u32 4294901760, %v2709_v21 }
  0x86   :  { %1028 = vmatpush.msrb.mxu3 %v2557_v34  ;;  %836 = vmatpush.msrb.mxu0 %v2584_v42 }
  0x87   :  { %986 = vmatpush.msrb.mxu2 %v2610_v32  ;;  %897 = vmatpush.msrb.mxu1 %v896_v1  ;;  %v2701_v1 = vsub.f32 %v137_v51, %v2677_v16  ;;  %v926_v51 = vand.u32 4294901760, %v925_v30  ;;  %v2721_v55 = vsub.f32 %v132_v3, %v2696_v11  ;;  %v943_v3 = vsub.f32 %v2682_v45, %v3336_v57 }
  0x88   :  { %1030 = vmatpush.msrb.mxu3 %v2571_v4  ;;  %838 = vmatpush.msrb.mxu0 %v2597_v9 }
  0x89   :  { %989 = vmatpush.msrb.mxu2 %v2622_v35  ;;  %903 = vmatpush.msrb.mxu1 %v902_v36  ;;  %3401 = vst [vmem:[#allocation12_spill] sm:$0xff] %v2701_v1  ;;  %v931_v36 = vsub.f32 %v2656_v24, %v3329_v28  ;;  %v2723_v28 = vand.u32 4294901760, %v122_v6  ;;  %v3341_v30 = vand.u32 4294901760, %v2701_v1  ;;  %v3346_v57 = vand.u32 4294901760, %v2721_v55 }
  0x8a   :  { %1032 = vmatpush.msrb.mxu3 %v2584_v42  ;;  %840 = vmatpush.msrb.mxu0 %v2601_v25  ;;  %3402 = vst [vmem:[#allocation14_spill] sm:$0xff] %v2721_v55 }
  0x8b   :  { %992 = vmatpush.msrb.mxu2 %v2627_v47  ;;  %909 = vmatpush.msrb.mxu1 %v908_v58  ;;  %v3338_v58 = vand.u32 4294901760, %v2694_v19  ;;  %v932_v8 = vand.u32 4294901760, %v931_v36  ;;  %v2748_v59 = vsub.f32 %v122_v6, %v2723_v28  ;;  %v955_v6 = vsub.f32 %v2709_v21, %v3342_v62 }
  0x8c   :  { %1034 = vmatpush.msrb.mxu3 %v2597_v9  ;;  %842 = vmatpush.msrb.mxu0 %v2614_v61  ;;  %v2785_v62 = vsub.f32 %v107_v50, %v2763_v63 }
  0x8d   :  { %995 = vmatpush.msrb.mxu2 %v2639_v41  ;;  %915 = vmatpush.msrb.mxu1 %v914_v49  ;;  %v2728_v49 = vand.u32 4294901760, %v117_v43  ;;  %v949_v36 = vsub.f32 %v2694_v19, %v3338_v58  ;;  %3404 = vst [vmem:[#allocation15_spill] sm:$0xff] %v2748_v59  ;;  %v944_v58 = vand.u32 4294901760, %v943_v3  ;;  %v1212_v3 = vsub.f32 %v2721_v55, %v3346_v57 }
  0x8e   :  { %1036 = vmatpush.msrb.mxu3 %v2601_v25  ;;  %844 = vmatpush.msrb.mxu0 %v2634_v39 }
  0x8f   :  { %998 = vmatpush.msrb.mxu2 %v2656_v24  ;;  %921 = vmatpush.msrb.mxu1 %v920_v7  ;;  %v938_v7 = vand.u32 4294901760, %v937_v15  ;;  %v2756_v22 = vsub.f32 %v117_v43, %v2728_v49  ;;  %v102_v15 = vld [vmem:[#allocation5 + $0x158] sm:$0xff]  ;;  %v2768_v43 = vsub.f32 %v112_v31, %v2740_v18  ;;  %v3408_v31 = vand.u32 4294901760, %v2748_v59 }
  0x90   :  { %1038 = vmatpush.msrb.mxu3 %v2614_v61  ;;  %846 = vmatpush.msrb.mxu0 %v2646_v26  ;;  %v2775_v60 = vand.u32 4294901760, %v102_v15 }
  0x91   :  { %1001 = vmatpush.msrb.mxu2 %v2668_v0  ;;  %927 = vmatpush.msrb.mxu1 %v926_v51  ;;  %v1206_v51 = vsub.f32 %v2701_v1, %v3341_v30  ;;  %3405 = vst [vmem:[#allocation16_spill] sm:$0xff] %v2756_v22  ;;  %v97_v30 = vld [vmem:[#allocation5 + $0x130] sm:$0xff]  ;;  %v3407_v1 = vand.u32 4294901760, %v2521_v53  ;;  %v3409_v53 = vand.u32 4294901760, %v2533_v48  ;;  %v3411_v48 = vand.u32 4294901760, %v2544_v56 }
  0x92   :  { %1040 = vmatpush.msrb.mxu3 %v2634_v39  ;;  %848 = vmatpush.msrb.mxu0 %v2658_v29  ;;  %v2787_v55 = vand.u32 4294901760, %v97_v30  ;;  %v2798_v50 = vsub.f32 %v102_v15, %v2775_v60  ;;  %v3413_v56 = vand.u32 4294901760, %v2555_v44  ;;  %v3414_v44 = vand.u32 4294901760, %v2569_v40 }
  0x93   :  { %1004 = vmatpush.msrb.mxu2 %v2682_v45  ;;  %933 = vmatpush.msrb.mxu1 %v932_v8  ;;  %v950_v8 = vand.u32 4294901760, %v949_v36  ;;  %v1207_v27 = vand.u32 4294901760, %v1206_v51  ;;  %v3406_v36 = vand.u32 4294901760, %v2736_v46  ;;  %v82_v51 = vld [vmem:[#allocation5 + $0xb8] sm:$0xff]  ;;  %v3415_v40 = vand.u32 4294901760, %v2582_v14 }
  0x94   :  { %1042 = vmatpush.msrb.mxu3 %v2646_v26  ;;  %850 = vmatpush.msrb.mxu0 %v2670_v54  ;;  %v2810_v15 = vsub.f32 %v97_v30, %v2787_v55 }
  0x95   :  { %1007 = vmatpush.msrb.mxu2 %v2694_v19  ;;  %939 = vmatpush.msrb.mxu1 %v938_v7  ;;  %v956_v7 = vand.u32 4294901760, %v955_v6  ;;  %v1218_v57 = vsub.f32 %v2736_v46, %v3406_v36  ;;  %v1213_v6 = vand.u32 4294901760, %v1212_v3  ;;  %v1224_v36 = vsub.f32 %v2748_v59, %v3408_v31 }
  0x96   :  { %1044 = vmatpush.msrb.mxu3 %v2658_v29  ;;  %852 = vmatpush.msrb.mxu0 %v2684_v5  ;;  %v2800_v46 = vand.u32 4294901760, %v92_v20  ;;  %v3357_v31 = vand.u32 4294901760, %v2785_v62 }
  0x97   :  { %1010 = vmatpush.msrb.mxu2 %v2709_v21  ;;  %945 = vmatpush.msrb.mxu1 %v944_v58  ;;  %v87_v58 = vld [vmem:[#allocation5 + $0xe0] sm:$0xff]  ;;  %v1219_v3 = vand.u32 4294901760, %v1218_v57  ;;  %v1247_v57 = vand.u32 4294901760, %v2798_v50 }
  0x98   :  { %1046 = vmatpush.msrb.mxu3 %v2670_v54  ;;  %1059 = vmatpush.msra.mxu0 %v3407_v1  ;;  %v3410_v1 = vand.u32 4294901760, %v2756_v22  ;;  %v2812_v59 = vand.u32 4294901760, %v87_v58  ;;  %v2823_v30 = vsub.f32 %v92_v20, %v2800_v46 }
  0x99   :  { %1163 = vmatpush.msra.mxu2 %v2677_v16  ;;  %951 = vmatpush.msrb.mxu1 %v950_v8 }
  0x9a   :  { %1048 = vmatpush.msrb.mxu3 %v2684_v5  ;;  %1063 = vmatpush.msra.mxu0 %v3409_v53  ;;  %v1230_v8 = vsub.f32 %v2756_v22, %v3410_v1  ;;  %v3412_v53 = vand.u32 4294901760, %v2768_v43  ;;  %v77_v22 = vld [vmem:[#allocation5 + $0x90] sm:$0xff]  ;;  %v2836_v20 = vsub.f32 %v87_v58, %v2812_v59 }
  0x9b   :  { %1165 = vmatpush.msra.mxu2 %v2696_v11  ;;  %957 = vmatpush.msrb.mxu1 %v956_v7  ;;  %v2825_v7 = vand.u32 4294901760, %v82_v51 }
  0x9c   :  { %1208 = vmatpush.msra.mxu3 %v1207_v27  ;;  %1067 = vmatpush.msra.mxu0 %v3411_v48  ;;  %v1236_v1 = vsub.f32 %v2768_v43, %v3412_v53  ;;  %v1225_v27 = vand.u32 4294901760, %v1224_v36  ;;  %v72_v48 = vld [vmem:[#allocation5 + $0x68] sm:$0xff]  ;;  %v1253_v36 = vand.u32 4294901760, %v2810_v15  ;;  %v2838_v53 = vand.u32 4294901760, %v77_v22 }
  0x9d   :  { %1126 = vmatpush.msra.mxu1 %v2506_v2  ;;  %1167 = vmatpush.msra.mxu2 %v2711_v37  ;;  %v1231_v2 = vand.u32 4294901760, %v1230_v8  ;;  %v1248_v8 = vsub.f32 %v2798_v50, %v1247_v57  ;;  %v2849_v58 = vsub.f32 %v82_v51, %v2825_v7 }
  0x9e   :  { %1214 = vmatpush.msra.mxu3 %v1213_v6  ;;  %1071 = vmatpush.msra.mxu0 %v3413_v56  ;;  %v1242_v6 = vsub.f32 %v2785_v62, %v3357_v31  ;;  %v2851_v56 = vand.u32 4294901760, %v72_v48  ;;  %v67_v31 = vld [vmem:[#allocation5 + $0x40] sm:$0xff]  ;;  %v2862_v51 = vsub.f32 %v77_v22, %v2838_v53 }
  0x9f   :  { %1128 = vmatpush.msra.mxu1 %v2515_v23  ;;  %1169 = vmatpush.msra.mxu2 %v2723_v28  ;;  %v1237_v23 = vand.u32 4294901760, %v1236_v1  ;;  %v1254_v1 = vsub.f32 %v2810_v15, %v1253_v36  ;;  %v2867_v14 = vand.u32 4294901760, %v67_v31 }
  0xa0   :  { %1220 = vmatpush.msra.mxu3 %v1219_v3  ;;  %1075 = vmatpush.msra.mxu0 %v3414_v44  ;;  %v1259_v3 = vand.u32 4294901760, %v2823_v30  ;;  %v3416_v44 = vand.u32 4294901760, %v2595_v52  ;;  %v2875_v22 = vsub.f32 %v72_v48, %v2851_v56  ;;  %v3417_v52 = vand.u32 4294901760, %v2610_v32 }
  0xa1   :  { %1130 = vmatpush.msra.mxu1 %v2525_v38  ;;  %1171 = vmatpush.msra.mxu2 %v2728_v49  ;;  %v1243_v38 = vand.u32 4294901760, %v1242_v6  ;;  %v3418_v48 = vand.u32 4294901760, %v2622_v35  ;;  %v2891_v32 = vsub.f32 %v67_v31, %v2867_v14 }
  0xa2   :  { %1226 = vmatpush.msra.mxu3 %v1225_v27  ;;  %1079 = vmatpush.msra.mxu0 %v3415_v40  ;;  %v1265_v27 = vand.u32 4294901760, %v2836_v20  ;;  %v1260_v6 = vsub.f32 %v2823_v30, %v1259_v3  ;;  %v1271_v40 = vand.u32 4294901760, %v2849_v58 }
  0xa3   :  { %1132 = vmatpush.msra.mxu1 %v2535_v33  ;;  %1173 = vmatpush.msra.mxu2 %v2740_v18  ;;  %v62_v33 = vld [vmem:[#allocation5 + $0x18] sm:$0xff] }
  0xa4   :  { %1232 = vmatpush.msra.mxu3 %v1231_v2  ;;  %1083 = vmatpush.msra.mxu0 %v3416_v44  ;;  %v1249_v2 = vand.u32 4294901760, %v1248_v8  ;;  %v1277_v8 = vand.u32 4294901760, %v2862_v51  ;;  %v2885_v44 = vand.u32 4294901760, %v62_v33 }
  0xa5   :  { %1134 = vmatpush.msra.mxu1 %v2546_v13  ;;  %1175 = vmatpush.msra.mxu2 %v2763_v63  ;;  %v1255_v13 = vand.u32 4294901760, %v1254_v1  ;;  %v1283_v1 = vand.u32 4294901760, %v2875_v22 }
  0xa6   :  { %1238 = vmatpush.msra.mxu3 %v1237_v23  ;;  %1087 = vmatpush.msra.mxu0 %v3417_v52  ;;  %v1266_v23 = vsub.f32 %v2836_v20, %v1265_v27  ;;  %v3419_v52 = vand.u32 4294901760, %v2627_v47  ;;  %v1278_v35 = vsub.f32 %v2862_v51, %v1277_v8  ;;  %v2906_v31 = vsub.f32 %v62_v33, %v2885_v44 }
  0xa7   :  { %1136 = vmatpush.msra.mxu1 %v2557_v34  ;;  %1177 = vmatpush.msra.mxu2 %v2775_v60  ;;  %v1261_v34 = vand.u32 4294901760, %v1260_v6  ;;  %v1289_v47 = vand.u32 4294901760, %v2891_v32  ;;  %v1284_v6 = vsub.f32 %v2875_v22, %v1283_v1  ;;  %v3422_v33 = vand.u32 4294901760, %v2668_v0 }
  0xa8   :  { %1244 = vmatpush.msra.mxu3 %v1243_v38  ;;  %1091 = vmatpush.msra.mxu0 %v3418_v48  ;;  %v1272_v38 = vsub.f32 %v2849_v58, %v1271_v40  ;;  %v3424_v0 = vand.u32 4294901760, %v2694_v19 }
  0xa9   :  { %1138 = vmatpush.msra.mxu1 %v2571_v4  ;;  %1179 = vmatpush.msra.mxu2 %v2787_v55  ;;  %v1267_v4 = vand.u32 4294901760, %v1266_v23  ;;  %v1290_v23 = vsub.f32 %v2891_v32, %v1289_v47 }
  0xaa   :  { %1250 = vmatpush.msra.mxu3 %v1249_v2  ;;  %1095 = vmatpush.msra.mxu0 %v3419_v52  ;;  %v3420_v2 = vand.u32 4294901760, %v2639_v41  ;;  %v1279_v41 = vand.u32 4294901760, %v1278_v35 }
  0xab   :  { %1140 = vmatpush.msra.mxu1 %v2584_v42  ;;  %1181 = vmatpush.msra.mxu2 %v2800_v46  ;;  %v1273_v42 = vand.u32 4294901760, %v1272_v38  ;;  %v1291_v48 = vand.u32 4294901760, %v1290_v23  ;;  %v3431_v38 = vld [vmem:[#allocation13_spill] sm:$0xff] }
  0xac   :  { %1256 = vmatpush.msra.mxu3 %v1255_v13  ;;  %1099 = vmatpush.msra.mxu0 %v3420_v2  ;;  %v3421_v13 = vand.u32 4294901760, %v2656_v24  ;;  %v1285_v24 = vand.u32 4294901760, %v1284_v6  ;;  %v3432_v52 = vand.u32 4294901760, %v3431_v38 }
  0xad   :  { %1142 = vmatpush.msra.mxu1 %v2597_v9  ;;  %1183 = vmatpush.msra.mxu2 %v2812_v59  ;;  %v1295_v9 = vand.u32 4294901760, %v2906_v31 }
  0xae   :  { %1262 = vmatpush.msra.mxu3 %v1261_v34  ;;  %1103 = vmatpush.msra.mxu0 %v3421_v13  ;;  %v3429_v34 = vld [vmem:[#allocation14_spill] sm:$0xff] }
  0xaf   :  { %1144 = vmatpush.msra.mxu1 %v2601_v25  ;;  %1185 = vmatpush.msra.mxu2 %v2825_v7  ;;  %v3423_v25 = vand.u32 4294901760, %v2682_v45 }
  0xb0   :  { %1268 = vmatpush.msra.mxu3 %v1267_v4  ;;  %1107 = vmatpush.msra.mxu0 %v3422_v33 }
  0xb1   :  { %1146 = vmatpush.msra.mxu1 %v2614_v61  ;;  %1187 = vmatpush.msra.mxu2 %v2838_v53  ;;  %v1296_v61 = vsub.f32 %v2906_v31, %v1295_v9 }
  0xb2   :  { %1274 = vmatpush.msra.mxu3 %v1273_v42  ;;  %1111 = vmatpush.msra.mxu0 %v3423_v25 }
  0xb3   :  { %1148 = vmatpush.msra.mxu1 %v2634_v39  ;;  %1189 = vmatpush.msra.mxu2 %v2851_v56  ;;  %v3425_v39 = vand.u32 4294901760, %v2709_v21  ;;  %v1297_v45 = vand.u32 4294901760, %v1296_v61  ;;  %v3428_v21 = vld [vmem:[#allocation17_spill] sm:$0xff] }
  0xb4   :  { %1280 = vmatpush.msra.mxu3 %v1279_v41  ;;  %1115 = vmatpush.msra.mxu0 %v3424_v0  ;;  %v83_v61 = vld [vmem:[#allocation5 + $0xc0] sm:$0xff] }
  0xb5   :  { %1150 = vmatpush.msra.mxu1 %v2646_v26  ;;  %1191 = vmatpush.msra.mxu2 %v2867_v14  ;;  %v3426_v26 = vld [vmem:[#allocation12_spill] sm:$0xff] }
  0xb6   :  { %1286 = vmatpush.msra.mxu3 %v1285_v24  ;;  %1013 = vmatmul.f32.vlgmr.msrb.gmra.mxu2 %v2395_v10  ;;  %v3427_v19 = vand.u32 4294901760, %v3426_v26 }
  0xb7   :  { %1119 = vmatpush.msra.mxu0 %v3425_v39  ;;  %1152 = vmatpush.msra.mxu1 %v2658_v29  ;;  %v3430_v29 = vand.u32 4294901760, %v3429_v34 }
  0xb8   :  { %1193 = vmatpush.msra.mxu2 %v2885_v44  ;;  %1292 = vmatpush.msra.mxu3 %v1291_v48 }
  0xb9   :  { %858 = vmatmul.f32.vlgmr.msrb.gmra.mxu0 %v2443_v12  ;;  %1052 = vmatmul.f32.vlgmr.msrb.gmra.mxu3 %v2416_v17 }
  0xba   :  { %1306 = vmatpush.msrb.mxu0 %v3426_v26  ;;  %1400 = vmatpush.msrb.mxu2 %v3427_v19  ;;  %v78_v26 = vld [vmem:[#allocation5 + $0x98] sm:$0xff] }
  0xbb   :  { %1154 = vmatpush.msra.mxu1 %v2670_v54  ;;  %1298 = vmatpush.msra.mxu3 %v1297_v45  ;;  %v3433_v54 = vld [vmem:[#allocation15_spill] sm:$0xff] }
  0xbc   :  { %959 = vmatmul.f32.vlgmr.msrb.gmra.mxu1 %v3428_v21  ;;  %1309 = vmatpush.msrb.mxu0 %v3429_v34  ;;  %v3434_v4 = vand.u32 4294901760, %v3433_v54 }
  0xbd   :  { %1404 = vmatpush.msrb.mxu2 %v3430_v29  ;;  %1467 = vmatpush.msrb.mxu3 %v2677_v16 }
  0xbe   :  { %1156 = vmatpush.msra.mxu1 %v2684_v5  ;;  %1312 = vmatpush.msrb.mxu0 %v3431_v38  ;;  %v3435_v5 = vld [vmem:[#allocation16_spill] sm:$0xff]  ;;  %v3119_v38 = vand.u32 4294901760, %v83_v61 }
  0xbf   :  { %1408 = vmatpush.msrb.mxu2 %v3432_v52  ;;  %1469 = vmatpush.msrb.mxu3 %v2696_v11 }
  0xc0   :  { %1359 = vmatpush.msrb.mxu1 %v2677_v16  ;;  %1315 = vmatpush.msrb.mxu0 %v3433_v54  ;;  %v3436_v16 = vand.u32 4294901760, %v3435_v5 }
  0xc1   :  { %1412 = vmatpush.msrb.mxu2 %v3434_v4  ;;  %1471 = vmatpush.msrb.mxu3 %v2711_v37  ;;  %v73_v4 = vld [vmem:[#allocation5 + $0x70] sm:$0xff] }
  0xc2   :  { %1361 = vmatpush.msrb.mxu1 %v2696_v11  ;;  %1121 = vmatmul.f32.vlgmr.msra.gmra.mxu0 %v3428_v21  ;;  %v3437_v11 = vand.u32 4294901760, %v2768_v43 }
  0xc3   :  { %1318 = vmatpush.msrb.mxu0 %v3435_v5  ;;  %1416 = vmatpush.msrb.mxu2 %v3436_v16 }
  0xc4   :  { %1363 = vmatpush.msrb.mxu1 %v2711_v37  ;;  %1473 = vmatpush.msrb.mxu3 %v2723_v28  ;;  %v3438_v37 = vand.u32 4294901760, %v2785_v62 }
  0xc5   :  { %1158 = vmatmul.f32.vlgmr.msra.gmra.mxu1 %v3428_v21  ;;  %1321 = vmatpush.msrb.mxu0 %v2768_v43 }
  0xc6   :  { %1365 = vmatpush.msrb.mxu1 %v2723_v28  ;;  %1420 = vmatpush.msrb.mxu2 %v3437_v11  ;;  %v138_v28 = vld [vmem:[#allocation5 + $0x278] sm:$0xff]  ;;  %v3131_v11 = vand.u32 4294901760, %v78_v26 }
  0xc7   :  { %1475 = vmatpush.msrb.mxu3 %v2728_v49  ;;  %1324 = vmatpush.msrb.mxu0 %v2785_v62  ;;  %v133_v62 = vld [vmem:[#allocation5 + $0x250] sm:$0xff] }
  0xc8   :  { %1367 = vmatpush.msrb.mxu1 %v2728_v49  ;;  %1424 = vmatpush.msrb.mxu2 %v3438_v37  ;;  %v128_v49 = vld [vmem:[#allocation5 + $0x228] sm:$0xff] }
  0xc9   :  { %1477 = vmatpush.msrb.mxu3 %v2740_v18  ;;  %1327 = vmatpush.msrb.mxu0 %v2798_v50  ;;  %v3012_v50 = vand.u32 4294901760, %v128_v49 }
  0xca   :  { %1369 = vmatpush.msrb.mxu1 %v2740_v18  ;;  %1428 = vmatpush.msrb.mxu2 %v1247_v57  ;;  %v2995_v18 = vand.u32 4294901760, %v138_v28 }
  0xcb   :  { %1479 = vmatpush.msrb.mxu3 %v2763_v63  ;;  %1330 = vmatpush.msrb.mxu0 %v2810_v15 }
  0xcc   :  { %1371 = vmatpush.msrb.mxu1 %v2763_v63  ;;  %1432 = vmatpush.msrb.mxu2 %v1253_v36  ;;  %v3002_v63 = vand.u32 4294901760, %v133_v62  ;;  %v3010_v43 = vsub.f32 %v138_v28, %v2995_v18 }
  0xcd   :  { %1481 = vmatpush.msrb.mxu3 %v2775_v60  ;;  %1333 = vmatpush.msrb.mxu0 %v2823_v30  ;;  %v177_v19 = vpop.f32.mrf.mxu0 }
  0xce   :  { %1373 = vmatpush.msrb.mxu1 %v2775_v60  ;;  %1436 = vmatpush.msrb.mxu2 %v1259_v3  ;;  %v123_v60 = vld [vmem:[#allocation5 + $0x200] sm:$0xff]  ;;  %v3022_v57 = vsub.f32 %v133_v62, %v3002_v63  ;;  %v1546_v30 = vand.u32 4294901760, %v3010_v43  ;;  %v108_v3 = vld [vmem:[#allocation5 + $0x188] sm:$0xff] }
  0xcf   :  { %1483 = vmatpush.msrb.mxu3 %v2787_v55  ;;  %1336 = vmatpush.msrb.mxu0 %v2836_v20  ;;  %v3019_v15 = vand.u32 4294901760, %v123_v60  ;;  %v3033_v20 = vsub.f32 %v128_v49, %v3012_v50  ;;  %v68_v62 = vld [vmem:[#allocation5 + $0x48] sm:$0xff] }
  0xd0   :  { %1375 = vmatpush.msrb.mxu1 %v2787_v55  ;;  %1440 = vmatpush.msrb.mxu2 %v1265_v27  ;;  %v118_v55 = vld [vmem:[#allocation5 + $0x1d8] sm:$0xff] }
  0xd1   :  { %1485 = vmatpush.msrb.mxu3 %v2800_v46  ;;  %1339 = vmatpush.msrb.mxu0 %v2849_v58  ;;  %v3030_v36 = vand.u32 4294901760, %v118_v55  ;;  %v3044_v27 = vsub.f32 %v123_v60, %v3019_v15 }
  0xd2   :  { %1377 = vmatpush.msrb.mxu1 %v2800_v46  ;;  %1444 = vmatpush.msrb.mxu2 %v1271_v40  ;;  %v113_v46 = vld [vmem:[#allocation5 + $0x1b0] sm:$0xff]  ;;  %v3048_v40 = vand.u32 4294901760, %v108_v3 }
  0xd3   :  { %1487 = vmatpush.msrb.mxu3 %v2812_v59  ;;  %1199 = vmatmul.f32.vlgmr.msra.gmra.mxu2 %v2443_v12  ;;  %v3041_v58 = vand.u32 4294901760, %v113_v46  ;;  %v1564_v35 = vand.u32 4294901760, %v3044_v27  ;;  %v278_v49 = vpop.f32.mrf.mxu1 }
  0xd4   :  { %1342 = vmatpush.msrb.mxu0 %v2862_v51  ;;  %1379 = vmatpush.msrb.mxu1 %v2812_v59  ;;  %v1552_v59 = vand.u32 4294901760, %v3022_v57  ;;  %v103_v51 = vld [vmem:[#allocation5 + $0x160] sm:$0xff] }
  0xd5   :  { %1448 = vmatpush.msrb.mxu2 %v1277_v8  ;;  %1489 = vmatpush.msrb.mxu3 %v2825_v7  ;;  %v3058_v8 = vsub.f32 %v118_v55, %v3030_v36  ;;  %v3072_v2 = vsub.f32 %v113_v46, %v3041_v58  ;;  %v1565_v33 = vsub.f32 %v3044_v27, %v1564_v35  ;;  %v3143_v46 = vand.u32 4294901760, %v73_v4 }
  0xd6   :  { %1345 = vmatpush.msrb.mxu0 %v2875_v22  ;;  %1300 = vmatmul.f32.vlgmr.msra.gmra.mxu3 %v3428_v21  ;;  %v1558_v22 = vand.u32 4294901760, %v3033_v20 }
  0xd7   :  { %1381 = vmatpush.msrb.mxu1 %v2825_v7  ;;  %1452 = vmatpush.msrb.mxu2 %v1283_v1  ;;  %v1547_v7 = vsub.f32 %v3010_v43, %v1546_v30  ;;  %v98_v1 = vld [vmem:[#allocation5 + $0x138] sm:$0xff]  ;;  %v1570_v6 = vand.u32 4294901760, %v3058_v8  ;;  %v1576_v23 = vand.u32 4294901760, %v3072_v2  ;;  %v1566_v34 = vand.u32 4294901760, %v1565_v33 }
  0xd8   :  { %1491 = vmatpush.msrb.mxu3 %v2838_v53  ;;  %1348 = vmatpush.msrb.mxu0 %v2891_v32  ;;  %v1553_v32 = vsub.f32 %v3022_v57, %v1552_v59  ;;  %v1559_v42 = vsub.f32 %v3033_v20, %v1558_v22  ;;  %v3085_v13 = vand.u32 4294901760, %v98_v1 }
  0xd9   :  { %1383 = vmatpush.msrb.mxu1 %v2838_v53  ;;  %1456 = vmatpush.msrb.mxu2 %v1289_v47  ;;  %v3062_v53 = vand.u32 4294901760, %v103_v51  ;;  %v1548_v47 = vand.u32 4294901760, %v1547_v7  ;;  %v1571_v0 = vsub.f32 %v3058_v8, %v1570_v6  ;;  %v1577_v29 = vsub.f32 %v3072_v2, %v1576_v23 }
  0xda   :  { %1493 = vmatpush.msrb.mxu3 %v2851_v56  ;;  %1351 = vmatpush.msrb.mxu0 %v2906_v31  ;;  %v93_v31 = vld [vmem:[#allocation5 + $0x110] sm:$0xff]  ;;  %v3110_v39 = vsub.f32 %v98_v1, %v3085_v13  ;;  %v63_v1 = vld [vmem:[#allocation5 + $0x20] sm:$0xff] }
  0xdb   :  { %1385 = vmatpush.msrb.mxu1 %v2851_v56  ;;  %1460 = vmatpush.msrb.mxu2 %v1295_v9  ;;  %v3077_v56 = vsub.f32 %v108_v3, %v3048_v40  ;;  %v3090_v41 = vsub.f32 %v103_v51, %v3062_v53  ;;  %v88_v9 = vld [vmem:[#allocation5 + $0xe8] sm:$0xff]  ;;  %v3098_v24 = vand.u32 4294901760, %v93_v31  ;;  %v1572_v5 = vand.u32 4294901760, %v1571_v0  ;;  %v332_v51 = vpop.f32.mrf.mxu2 }
  0xdc   :  { %1495 = vmatpush.msrb.mxu3 %v2867_v14  ;;  %1462 = vmatmul.f32.vlgmr.msrb.gmra.mxu2 %v3428_v21  ;;  %v3107_v48 = vand.u32 4294901760, %v88_v9  ;;  %v1594_v16 = vand.u32 4294901760, %v3110_v39  ;;  %v1578_v60 = vand.u32 4294901760, %v1577_v29  ;;  %v3146_v3 = vsub.f32 %v83_v61, %v3119_v38 }
  0xdd   :  { %1504 = vmatpush.msra.mxu0 %v2995_v18  ;;  %1387 = vmatpush.msrb.mxu1 %v2867_v14  ;;  %v1554_v14 = vand.u32 4294901760, %v1553_v32  ;;  %v1582_v25 = vand.u32 4294901760, %v3077_v56  ;;  %v1588_v45 = vand.u32 4294901760, %v3090_v41  ;;  %v3122_v52 = vsub.f32 %v93_v31, %v3098_v24 }
  0xde   :  { %1497 = vmatpush.msrb.mxu3 %v2885_v44  ;;  %1354 = vmatmul.f32.vlgmr.msrb.gmra.mxu0 %v2395_v10  ;;  %v3134_v37 = vsub.f32 %v88_v9, %v3107_v48  ;;  %v1595_v32 = vsub.f32 %v3110_v39, %v1594_v16  ;;  %v3358_v61 = vand.u32 4294901760, %v3146_v3  ;;  %v3170_v0 = vsub.f32 %v73_v4, %v3143_v46 }
  0xdf   :  { %1499 = vmatmul.f32.vlgmr.msrb.gmra.mxu3 %v3428_v21  ;;  %1506 = vmatpush.msra.mxu0 %v3002_v63  ;;  %v1583_v54 = vsub.f32 %v3077_v56, %v1582_v25  ;;  %v1589_v28 = vsub.f32 %v3090_v41, %v1588_v45  ;;  %v3361_v55 = vand.u32 4294901760, %v3122_v52 }
  0xe0   :  { %1389 = vmatpush.msrb.mxu1 %v2885_v44  ;;  %1647 = vmatpush.msra.mxu2 %v3010_v43  ;;  %v1560_v44 = vand.u32 4294901760, %v1559_v42  ;;  %v3359_v31 = vand.u32 4294901760, %v3134_v37  ;;  %v3158_v42 = vsub.f32 %v78_v26, %v3131_v11  ;;  %v279_v26 = vadd.f32 %v278_v49, %v177_v19 }
  0xe1   :  { %1393 = vmatmul.f32.vlgmr.msrb.gmra.mxu1 %v2416_v17  ;;  %1508 = vmatpush.msra.mxu0 %v3012_v50  ;;  %v1584_v7 = vand.u32 4294901760, %v1583_v54  ;;  %v1590_v9 = vand.u32 4294901760, %v1589_v28  ;;  %v1601_v33 = vsub.f32 %v3122_v52, %v3361_v55  ;;  %v1596_v29 = vand.u32 4294901760, %v1595_v32  ;;  %v477_v32 = vpop.f32.mrf.mxu1 }
  0xe2   :  { %1549 = vmatpush.msra.mxu1 %v1548_v47  ;;  %1650 = vmatpush.msra.mxu2 %v3022_v57  ;;  %v3155_v47 = vand.u32 4294901760, %v68_v62  ;;  %v1607_v54 = vsub.f32 %v3134_v37, %v3359_v31  ;;  %v1613_v4 = vsub.f32 %v3146_v3, %v3358_v61  ;;  %v1624_v49 = vand.u32 4294901760, %v3170_v0 }
  0xe3   :  { %1700 = vmatpush.msra.mxu3 %v2995_v18  ;;  %1510 = vmatpush.msra.mxu0 %v3019_v15  ;;  %v1602_v19 = vand.u32 4294901760, %v1601_v33 }
  0xe4   :  { %1555 = vmatpush.msra.mxu1 %v1554_v14  ;;  %1653 = vmatpush.msra.mxu2 %v3033_v20  ;;  %v371_v14 = vpop.f32.mrf.mxu3  ;;  %v3180_v28 = vsub.f32 %v68_v62, %v3155_v47 }
  0xe5   :  { %1702 = vmatpush.msra.mxu3 %v3002_v63  ;;  %1512 = vmatpush.msra.mxu0 %v3030_v36 }
  0xe6   :  { %1561 = vmatpush.msra.mxu1 %v1560_v44  ;;  %1656 = vmatpush.msra.mxu2 %v3044_v27  ;;  %v3167_v44 = vand.u32 4294901760, %v63_v1  ;;  %v1630_v61 = vand.u32 4294901760, %v3180_v28 }
  0xe7   :  { %1704 = vmatpush.msra.mxu3 %v3012_v50  ;;  %1514 = vmatpush.msra.mxu0 %v3041_v58 }
  0xe8   :  { %1567 = vmatpush.msra.mxu1 %v1566_v34  ;;  %1659 = vmatpush.msra.mxu2 %v3058_v8  ;;  %v440_v34 = vpop.f32.mrf.mxu0 }
  0xe9   :  { %1706 = vmatpush.msra.mxu3 %v3019_v15  ;;  %1516 = vmatpush.msra.mxu0 %v3048_v40 }
  0xea   :  { %1573 = vmatpush.msra.mxu1 %v1572_v5  ;;  %1662 = vmatpush.msra.mxu2 %v3072_v2  ;;  %v3360_v5 = vand.u32 4294901760, %v3158_v42 }
  0xeb   :  { %1708 = vmatpush.msra.mxu3 %v3030_v36  ;;  %1518 = vmatpush.msra.mxu0 %v3062_v53 }
  0xec   :  { %1579 = vmatpush.msra.mxu1 %v1578_v60  ;;  %1665 = vmatpush.msra.mxu2 %v3077_v56  ;;  %v3190_v60 = vsub.f32 %v63_v1, %v3167_v44  ;;  %v1619_v33 = vsub.f32 %v3158_v42, %v3360_v5  ;;  %v1625_v1 = vsub.f32 %v3170_v0, %v1624_v49 }
  0xed   :  { %1710 = vmatpush.msra.mxu3 %v3041_v58  ;;  %1520 = vmatpush.msra.mxu0 %v3085_v13 }
  0xee   :  { %1585 = vmatpush.msra.mxu1 %v1584_v7  ;;  %1668 = vmatpush.msra.mxu2 %v3090_v41  ;;  %v333_v7 = vadd.f32 %v332_v51, %v279_v26  ;;  %v1614_v51 = vand.u32 4294901760, %v1613_v4  ;;  %v1620_v5 = vand.u32 4294901760, %v1619_v33 }
  0xef   :  { %1712 = vmatpush.msra.mxu3 %v3048_v40  ;;  %1522 = vmatpush.msra.mxu0 %v3098_v24 }
  0xf0   :  { %1591 = vmatpush.msra.mxu1 %v1590_v9  ;;  %v518_v62 = vpop.f32.mrf.mxu2  ;;  %1671 = vmatpush.msra.mxu2 %v3110_v39  ;;  %v1608_v9 = vand.u32 4294901760, %v1607_v54  ;;  %v372_v54 = vadd.f32 %v371_v14, %v333_v7  ;;  %v1626_v14 = vand.u32 4294901760, %v1625_v1 }
  0xf1   :  { %1714 = vmatpush.msra.mxu3 %v3062_v53  ;;  %1524 = vmatpush.msra.mxu0 %v3107_v48 }
  0xf2   :  { %1597 = vmatpush.msra.mxu1 %v1596_v29  ;;  %1674 = vmatpush.msra.mxu2 %v3122_v52  ;;  %v1636_v29 = vand.u32 4294901760, %v3190_v60 }
  0xf3   :  { %1716 = vmatpush.msra.mxu3 %v3085_v13  ;;  %1526 = vmatpush.msra.mxu0 %v3119_v38  ;;  %v619_v26 = vpop.f32.mrf.mxu3 }
  0xf4   :  { %1603 = vmatpush.msra.mxu1 %v1602_v19  ;;  %v620_v31 = vadd.f32 %v619_v26, %v518_v62  ;;  %1677 = vmatpush.msra.mxu2 %v3134_v37  ;;  %v1631_v19 = vsub.f32 %v3180_v28, %v1630_v61  ;;  %v1637_v7 = vsub.f32 %v3190_v60, %v1636_v29 }
  0xf5   :  { %1718 = vmatpush.msra.mxu3 %v3098_v24  ;;  %1528 = vmatpush.msra.mxu0 %v3131_v11  ;;  %v441_v62 = vadd.f32 %v440_v34, %v372_v54 }
  0xf6   :  { %1609 = vmatpush.msra.mxu1 %v1608_v9  ;;  %v673_v4 = vpop.f32.mrf.mxu0  ;;  %1680 = vmatpush.msra.mxu2 %v3146_v3  ;;  %v3220_v9 = vld [vmem:[#allocation7] sm:$0x1f]  ;;  %v1638_v34 = vand.u32 4294901760, %v1637_v7 }
  0xf7   :  { %v674_v55 = vadd.f32 %v673_v4, %v620_v31  ;;  %1720 = vmatpush.msra.mxu3 %v3107_v48  ;;  %1530 = vmatpush.msra.mxu0 %v3143_v46  ;;  %v1632_v31 = vand.u32 4294901760, %v1631_v19  ;;  %v1846_v1 = vperm.slane %v3220_v9, 0  ;;  %v1847_v19 = vperm.slane %v3220_v9, 1 }
  0xf8   :  { %1615 = vmatpush.msra.mxu1 %v1614_v51  ;;  %1683 = vmatpush.msra.mxu2 %v3158_v42  ;;  %v478_v51 = vadd.f32 %v477_v32, %v441_v62 }
  0xf9   :  { %1722 = vmatpush.msra.mxu3 %v3119_v38  ;;  %1532 = vmatpush.msra.mxu0 %v3155_v47  ;;  %v712_v33 = vpop.f32.mrf.mxu1  ;;  %v781_v26 = vpop.f32.mrf.mxu2 }
  0xfa   :  { %1621 = vmatpush.msra.mxu1 %v1620_v5  ;;  %v713_v4 = vadd.f32 %v712_v33, %v674_v55  ;;  %1686 = vmatpush.msra.mxu2 %v3170_v0  ;;  %v1856_v43 = vsub.f32 %v1846_v1, %v478_v51 }
  0xfb   :  { %1724 = vmatpush.msra.mxu3 %v3131_v11  ;;  %1534 = vmatpush.msra.mxu0 %v3167_v44 }
  0xfc   :  { %1627 = vmatpush.msra.mxu1 %v1626_v14  ;;  %v782_v54 = vadd.f32 %v781_v26, %v713_v4  ;;  %v818_v5 = vpop.f32.mrf.mxu3  ;;  %1689 = vmatpush.msra.mxu2 %v3180_v28  ;;  %v1861_v20 = vmul.f32 %v1856_v43, %v1856_v43  ;;  %v1850_v14 = vperm.slane %v3220_v9, 4 }
  0xfd   :  { %1741 = vmatpush.msrb.mxu0 %v1546_v30  ;;  %1726 = vmatpush.msra.mxu3 %v3143_v46 }
  0xfe   :  { %1633 = vmatpush.msra.mxu1 %v1632_v31  ;;  %v819_v55 = vadd.f32 %v818_v5, %v782_v54  ;;  %1692 = vmatpush.msra.mxu2 %v3190_v60 }
  0xff   :  { %1745 = vmatpush.msrb.mxu0 %v1552_v59  ;;  %1728 = vmatpush.msra.mxu3 %v3155_v47 }
 0x100   :  { %1639 = vmatpush.msra.mxu1 %v1638_v34  ;;  %v1857_v30 = vsub.f32 %v1847_v19, %v819_v55  ;;  %1695 = vmatmul.f32.vlgmr.msra.gmra.mxu2 %v2395_v10 }
 0x101   :  { %1749 = vmatpush.msrb.mxu0 %v1558_v22  ;;  %1730 = vmatpush.msra.mxu3 %v3167_v44 }
 0x102   :  { %1808 = vmatpush.msrb.mxu1 %v2995_v18  ;;  %v1862_v57 = vmul.f32 %v1857_v30, %v1857_v30  ;;  %1540 = vmatmul.f32.vlgmr.msra.gmra.mxu0 %v2443_v12  ;;  %v3440_v12 = vand.u32 4294901760, %v3134_v37 }
 0x103   :  { %1753 = vmatpush.msrb.mxu0 %v1564_v35  ;;  %1734 = vmatmul.f32.vlgmr.msra.gmra.mxu3 %v2416_v17  ;;  %v3439_v17 = vand.u32 4294901760, %v3122_v52 }
 0x104   :  { %1810 = vmatpush.msrb.mxu1 %v3002_v63  ;;  %v1870_v10 = vrot.slane %v1862_v57, 4  ;;  %v3441_v63 = vand.u32 4294901760, %v3146_v3 }
 0x105   :  { %1757 = vmatpush.msrb.mxu0 %v1570_v6  ;;  %1641 = vmatmul.f32.vlgmr.msra.gmra.mxu1 %v3428_v21 }
 0x106   :  { %1812 = vmatpush.msrb.mxu1 %v3012_v50  ;;  %v1873_v18 = vsel %vm1872_vm0, %v1861_v20, %v1870_v10  ;;  %v3442_v50 = vand.u32 4294901760, %v3158_v42 }
 0x107   :  { %1761 = vmatpush.msrb.mxu0 %v1576_v23  ;;  %1877 = vst [vmem:[#allocation8] sm:$0xff] %v1873_v18 }
 0x108   :  { %1814 = vmatpush.msrb.mxu1 %v3019_v15 }
 0x109   :  { %1765 = vmatpush.msrb.mxu0 %v1582_v25 }
 0x10a   :  { %1816 = vmatpush.msrb.mxu1 %v3030_v36 }
 0x10b   :  { %1769 = vmatpush.msrb.mxu0 %v1588_v45  ;;  %v1849_v45 = vperm.slane %v3220_v9, 3 }
 0x10c   :  { %1818 = vmatpush.msrb.mxu1 %v3041_v58 }
 0x10d   :  { %1773 = vmatpush.msrb.mxu0 %v1594_v16 }
 0x10e   :  { %1820 = vmatpush.msrb.mxu1 %v3048_v40 }
 0x10f   :  { %1777 = vmatpush.msrb.mxu0 %v3439_v17 }
 0x110   :  { %1822 = vmatpush.msrb.mxu1 %v3062_v53 }
 0x111   :  { %1781 = vmatpush.msrb.mxu0 %v3440_v12 }
 0x112   :  { %1824 = vmatpush.msrb.mxu1 %v3085_v13 }
 0x113   :  { %1785 = vmatpush.msrb.mxu0 %v3441_v63 }
 0x114   :  { %1826 = vmatpush.msrb.mxu1 %v3098_v24 }
 0x115   :  { %1789 = vmatpush.msrb.mxu0 %v3442_v50 }
 0x116   :  { %1828 = vmatpush.msrb.mxu1 %v3107_v48 }
 0x117   :  { %1793 = vmatpush.msrb.mxu0 %v1624_v49 }
 0x118   :  { %1830 = vmatpush.msrb.mxu1 %v3119_v38 }
 0x119   :  { %1797 = vmatpush.msrb.mxu0 %v1630_v61 }
 0x11a   :  { %1832 = vmatpush.msrb.mxu1 %v3131_v11 }
 0x11b   :  { %1801 = vmatpush.msrb.mxu0 %v1636_v29 }
 0x11c   :  { %1834 = vmatpush.msrb.mxu1 %v3143_v46  ;;  %1803 = vmatmul.f32.vlgmr.msrb.gmra.mxu0 %v3428_v21 }
 0x11e   :  { %1836 = vmatpush.msrb.mxu1 %v3155_v47 }
 0x120   :  { %1838 = vmatpush.msrb.mxu1 %v3167_v44 }
 0x121   :  { %1840 = vmatmul.f32.vlgmr.msrb.gmra.mxu1 %v3428_v21  ;;  %v1848_v21 = vperm.slane %v3220_v9, 2 }
 0x136   :  { %v859_v15 = vpop.f32.mrf.mxu0 }
 0x139   :  { %v960_v36 = vpop.f32.mrf.mxu1  ;;  %v1014_v59 = vpop.f32.mrf.mxu2 }
 0x13a   :  { %v961_v58 = vadd.f32 %v960_v36, %v859_v15 }
 0x13c   :  { %v1053_v27 = vpop.f32.mrf.mxu3  ;;  %v1015_v22 = vadd.f32 %v1014_v59, %v961_v58 }
 0x13e   :  { %v1054_v35 = vadd.f32 %v1053_v27, %v1015_v22 }
 0x13f   :  { %v1122_v40 = vpop.f32.mrf.mxu0 }
 0x140   :  { %v1123_v13 = vadd.f32 %v1122_v40, %v1054_v35 }
 0x142   :  { %v1159_v8 = vpop.f32.mrf.mxu1 }
 0x143   :  { %v1160_v48 = vadd.f32 %v1159_v8, %v1123_v13 }
 0x145   :  { %v1858_v16 = vsub.f32 %v1848_v21, %v1160_v48 }
 0x147   :  { %v1863_v46 = vmul.f32 %v1858_v16, %v1858_v16 }
 0x156   :  { %v1200_v53 = vpop.f32.mrf.mxu2 }
 0x159   :  { %v1301_v2 = vpop.f32.mrf.mxu3 }
 0x15a   :  { %v1302_v56 = vadd.f32 %v1301_v2, %v1200_v53 }
 0x15b   :  { %v1355_v6 = vpop.f32.mrf.mxu0 }
 0x15c   :  { %v1356_v41 = vadd.f32 %v1355_v6, %v1302_v56 }
 0x15e   :  { %v1394_v23 = vpop.f32.mrf.mxu1 }
 0x15f   :  { %v1395_v24 = vadd.f32 %v1394_v23, %v1356_v41  ;;  %v1463_v25 = vpop.f32.mrf.mxu2 }
 0x161   :  { %v1464_v39 = vadd.f32 %v1463_v25, %v1395_v24 }
 0x162   :  { %v1500_v38 = vpop.f32.mrf.mxu3 }
 0x163   :  { %v1501_v52 = vadd.f32 %v1500_v38, %v1464_v39 }
 0x165   :  { %v1859_v11 = vsub.f32 %v1849_v45, %v1501_v52 }
 0x167   :  { %v1864_v37 = vmul.f32 %v1859_v11, %v1859_v11 }
 0x169   :  { %v1871_v3 = vrot.slane %v1864_v37, 4 }
 0x16b   :  { %v1874_v47 = vsel %vm1872_vm0, %v1863_v46, %v1871_v3 }
 0x16c   :  { %1878 = vst [vmem:[#allocation8 + $0x8] sm:$0xff] %v1874_v47 }
 0x17f   :  { %v1541_v61 = vpop.f32.mrf.mxu0 }
 0x182   :  { %v1642_v42 = vpop.f32.mrf.mxu1 }
 0x183   :  { %v1643_v44 = vadd.f32 %v1642_v42, %v1541_v61  ;;  %v1696_v0 = vpop.f32.mrf.mxu2 }
 0x185   :  { %v1697_v28 = vadd.f32 %v1696_v0, %v1643_v44 }
 0x186   :  { %v1735_v49 = vpop.f32.mrf.mxu3 }
 0x187   :  { %v1736_v60 = vadd.f32 %v1735_v49, %v1697_v28 }
 0x199   :  { %v1804_v32 = vpop.f32.mrf.mxu0 }
 0x19a   :  { %v1805_v29 = vadd.f32 %v1804_v32, %v1736_v60 }
 0x19e   :  { %v1841_v7 = vpop.f32.mrf.mxu1 }
 0x19f   :  { %v1842_v62 = vadd.f32 %v1841_v7, %v1805_v29 }
 0x1a1   :  { %v1860_v31 = vsub.f32 %v1850_v14, %v1842_v62 }
 0x1a3   :  { %v1865_v33 = vmul.f32 %v1860_v31, %v1860_v31 }
 0x1a5   :  { %1879 = vst [vmem:[#allocation8 + $0x10] sm:$0xf] %v1865_v33 }
 0x1a6   :  { %1890 = dma.vmem_to_hbm [thread:$0]  %s1886_s2, 320, %s1888_s30, [#allocation4]  }
 0x1a7   :  { %2004 = dma.done.wait [#allocation4], 320  }
 0x1a8   :  { %2005 = vsyncadd [#allocation4], 4294966976 }
 0x1a9   :  { %1895 = vsyncpa [#allocation3], 1 }
 0x1aa   :  { %1896 = vsyncpa [#allocation6], 1 }
 0x1ab   :  { %1897 = vsyncpa [#allocation4], 1 }

</bundles_post_ra>
